<compile_context>
chip_gen: v7x
topology: tpu7x:2x2x1
jax: 0.10.0
libtpu: 0.0.40
codegen_flags: <defaults>
</compile_context>

<pallas_src>
import jax
import jax.numpy as jnp
from jax.experimental import pallas as pl
from jax.experimental.pallas import tpu as pltpu


def _make_kernel(B_blk, T, E, H, C1, C2):
    """Build the block kernel with static shape constants closed over."""

    def kernel(tok_ref,              # SMEM (B, T) int32   (scalar prefetch)
               wemb_ref,             # VMEM (V, E)  f32
               wih_ref,              # VMEM (E, 4H) bf16   gates reordered [i,f,o,g]
               whh_ref,              # VMEM (H, 4H) bf16
               b_ref,                # VMEM (1, 4H) f32
               w1_ref, b1_ref,       # VMEM (H, C1) bf16 / (1, C1) f32
               w2_ref, b2_ref,       # VMEM (C1, C2) bf16 / (1, C2) f32
               out_ref):             # VMEM (B_blk, C2*H) f32
        b0 = pl.program_id(0) * B_blk

        # ---- fused embedding gather, time-major rows r = t*B_blk + b ----
        rows = []
        for t in range(T):
            for b in range(B_blk):
                tok = tok_ref[b0 + b, t]                       # SMEM scalar read
                rows.append(wemb_ref[pl.ds(tok, 1), :])        # (1, E) dynamic row
        x2d = jnp.concatenate(rows, axis=0)                    # (T*B_blk, E) f32

        # ---- hoisted input projection: one matmul for all steps ----
        xg = jnp.dot(x2d.astype(jnp.bfloat16), wih_ref[...],
                     preferred_element_type=jnp.float32) + b_ref[...]   # (T*B_blk, 4H)

        whh = whh_ref[...]                                     # (H, 4H) bf16, hoisted

        # ---- recurrence: fully unrolled over T, batched over B_blk rows ----
        h = jnp.zeros((B_blk, H), jnp.float32)
        c = jnp.zeros((B_blk, H), jnp.float32)
        hs = []
        for t in range(T):
            xg_t = xg[t * B_blk:(t + 1) * B_blk, :]            # static leading slice
            gates = xg_t + jnp.dot(h.astype(jnp.bfloat16), whh,
                                   preferred_element_type=jnp.float32)
            sig = jax.nn.sigmoid(gates[:, :3 * H])             # [i | f | o] in one go
            i_g = sig[:, :H]
            f_g = sig[:, H:2 * H]
            o_g = sig[:, 2 * H:3 * H]
            g_g = jnp.tanh(gates[:, 3 * H:])                   # g
            c = f_g * c + i_g * g_g
            h = o_g * jnp.tanh(c)
            hs.append(h)

        lstm_tm = jnp.concatenate(hs, axis=0)                  # (T*B_blk, H) time-major

        # ---- conv1 (k=1) + ReLU, conv2 (k=1): pointwise channel matmuls ----
        a1 = jnp.dot(lstm_tm.astype(jnp.bfloat16), w1_ref[...],
                     preferred_element_type=jnp.float32) + b1_ref[...]
        a1 = jnp.maximum(a1, 0.0)
        a2 = jnp.dot(a1.astype(jnp.bfloat16), w2_ref[...],
                     preferred_element_type=jnp.float32) + b2_ref[...]  # (T*B_blk, C2)

        # ---- softmax over time (per batch row & glimpse), static slices only ----
        a2_ts = [a2[t * B_blk:(t + 1) * B_blk, :] for t in range(T)]   # T x (B_blk, C2)
        m = a2_ts[0]
        for t in range(1, T):
            m = jnp.maximum(m, a2_ts[t])
        e_ts = [jnp.exp(a2_ts[t] - m) for t in range(T)]
        denom = e_ts[0]
        for t in range(1, T):
            denom = denom + e_ts[t]
        inv = pl.reciprocal(denom, approx=True)                # (B_blk, C2)
        w_ts = [e_ts[t] * inv for t in range(T)]

        # ---- attention pooling: feature[b, g, :] = sum_t p[t,b,g] * h[t,b,:] ----
        # C2 is tiny, so VPU multiply-accumulate beats a batched matmul here.
        feats = []
        for g in range(C2):
            acc = w_ts[0][:, g:g + 1] * hs[0]
            for t in range(1, T):
                acc = acc + w_ts[t][:, g:g + 1] * hs[t]
            feats.append(acc)                                  # (B_blk, H)

        # single lane-dense 2-D store; layout matches (B, C2, H).reshape(B, C2*H)
        out_ref[...] = jnp.concatenate(feats, axis=1)          # (B_blk, C2*H)

    return kernel


def att_question_embedding(tokens, params, *, batch_block=None):
    """tokens: int32 (B, T). Returns float32 (B, conv2_out * LSTM_hidden_size)."""
    (W_emb, W_ih, W_hh, b_ih, b_hh, W1, b1, W2, b2) = params
    B, T = tokens.shape
    V, E = W_emb.shape
    H = W_hh.shape[1]
    C1 = W1.shape[0]
    C2 = W2.shape[0]
    assert W1.shape[2] == 1 and W2.shape[2] == 1, \
        "only kernel_size=1 / padding=0 Conv1d supported"

    # Default: pack the whole batch into one block when it is small (grid=(1,)),
    # including on v7x -- splitting a tiny batch across TensorCores does not
    # shorten the serial T-step chain.  For larger B pick the biggest
    # sublane-aligned divisor under a cap (the cap bounds the unrolled in-kernel
    # gather trace; switch to fori_loop + VMEM scratch for bigger blocks).
    if batch_block is None:
        cap = 64
        if B <= cap:
            batch_block = B
        else:
            divs = [d for d in range(8, cap + 1, 8) if B % d == 0]
            batch_block = max(divs) if divs else B
    assert B % batch_block == 0
    grid = (B // batch_block,)

    # Reorder LSTM gates from PyTorch [i, f, g, o] to [i, f, o, g] so the kernel
    # applies one sigmoid to a contiguous 3H slice and one tanh to the last H.
    perm = jnp.concatenate([jnp.arange(0, H), jnp.arange(H, 2 * H),
                            jnp.arange(3 * H, 4 * H), jnp.arange(2 * H, 3 * H)])
    wih_t = W_ih.T[:, perm].astype(jnp.bfloat16)                     # (E, 4H)
    whh_t = W_hh.T[:, perm].astype(jnp.bfloat16)                     # (H, 4H) bf16
    b_sum = (b_ih + b_hh)[perm].reshape(1, 4 * H).astype(jnp.float32)
    w1_t = W1[:, :, 0].T.astype(jnp.bfloat16)                        # (H, C1)
    b1r = b1.reshape(1, C1).astype(jnp.float32)
    w2_t = W2[:, :, 0].T.astype(jnp.bfloat16)                        # (C1, C2)
    b2r = b2.reshape(1, C2).astype(jnp.float32)

    kernel = _make_kernel(batch_block, T, E, H, C1, C2)

    out = pl.pallas_call(
        kernel,
        out_shape=jax.ShapeDtypeStruct((B, C2 * H), jnp.float32),
        grid_spec=pltpu.PrefetchScalarGridSpec(
            num_scalar_prefetch=1,          # tokens -> SMEM, passed to index_maps
            grid=grid,
            in_specs=[
                pl.BlockSpec((V, E), lambda bb, tok: (0, 0)),        # embedding table
                pl.BlockSpec((E, 4 * H), lambda bb, tok: (0, 0)),
                pl.BlockSpec((H, 4 * H), lambda bb, tok: (0, 0)),
                pl.BlockSpec((1, 4 * H), lambda bb, tok: (0, 0)),
                pl.BlockSpec((H, C1), lambda bb, tok: (0, 0)),
                pl.BlockSpec((1, C1), lambda bb, tok: (0, 0)),
                pl.BlockSpec((C1, C2), lambda bb, tok: (0, 0)),
                pl.BlockSpec((1, C2), lambda bb, tok: (0, 0)),
            ],
            out_specs=pl.BlockSpec((batch_block, C2 * H), lambda bb, tok: (bb, 0)),
        ),
        compiler_params=pltpu.CompilerParams(
            dimension_semantics=("parallel",)),
    )(tokens.astype(jnp.int32), W_emb.astype(jnp.float32),
      wih_t, whh_t, b_sum, w1_t, b1r, w2_t, b2r)

    return out


def reference_forward(tokens, params):
    """Pure-JAX reference reproducing the PyTorch forward (eval-mode dropout)."""
    (W_emb, W_ih, W_hh, b_ih, b_hh, W1, b1, W2, b2) = params
    B, T = tokens.shape
    H = W_hh.shape[1]
    embed = W_emb[tokens]                                            # (B, T, E)

    h = jnp.zeros((B, H), jnp.float32)
    c = jnp.zeros((B, H), jnp.float32)
    outs = []
    for t in range(T):
        x_t = embed[:, t, :]
        gates = x_t @ W_ih.T + h @ W_hh.T + b_ih + b_hh
        i_g = jax.nn.sigmoid(gates[:, 0:H])
        f_g = jax.nn.sigmoid(gates[:, H:2 * H])
        g_g = jnp.tanh(gates[:, 2 * H:3 * H])
        o_g = jax.nn.sigmoid(gates[:, 3 * H:4 * H])
        c = f_g * c + i_g * g_g
        h = o_g * jnp.tanh(c)
        outs.append(h)
    lstm = jnp.stack(outs, axis=1)                                   # (B, T, H)

    a1 = jax.nn.relu(jnp.einsum('bth,ch->btc', lstm, W1[:, :, 0]) + b1)
    a2 = jnp.einsum('btc,dc->btd', a1, W2[:, :, 0]) + b2             # (B, T, C2)
    p = jax.nn.softmax(a2, axis=1)                                   # softmax over T
    feat = jnp.einsum('btc,bth->bch', p, lstm)                       # (B, C2, H)
    return feat.reshape(B, -1)


def make_params(key, num_vocab, E, H, C1, C2):
    ks = jax.random.split(key, 9)
    u = lambda k, shape, s: jax.random.uniform(k, shape, jnp.float32, -s, s)
    W_emb = u(ks[0], (num_vocab, E), 0.5)
    W_ih = u(ks[1], (4 * H, E), 0.1)
    W_hh = u(ks[2], (4 * H, H), 0.1)
    b_ih = u(ks[3], (4 * H,), 0.1)
    b_hh = u(ks[4], (4 * H,), 0.1)
    W1 = u(ks[5], (C1, H, 1), 0.2)      # conv1: (out, in, kernel=1)
    b1 = u(ks[6], (C1,), 0.1)
    W2 = u(ks[7], (C2, C1, 1), 0.2)     # conv2: (out, in, kernel=1)
    b2 = u(ks[8], (C2,), 0.1)
    return (W_emb, W_ih, W_hh, b_ih, b_hh, W1, b1, W2, b2)


if __name__ == "__main__":
    # Module hyperparameters (small, self-consistent with the forward pass):
    num_vocab = 50
    embedding_dim = 32
    LSTM_hidden_size = 32
    conv1_out = 16
    conv2_out = 2          # "glimpses"
    B, T = 2, 8            # batch, sequence length

    key = jax.random.PRNGKey(0)
    k_tok, k_par = jax.random.split(key)
    tokens = jax.random.randint(k_tok, (B, T), 0, num_vocab, dtype=jnp.int32)
    params = make_params(k_par, num_vocab, embedding_dim, LSTM_hidden_size,
                         conv1_out, conv2_out)

    out = att_question_embedding(tokens, params)
    out = jax.block_until_ready(out)

    ref = reference_forward(tokens, params)
    assert out.shape == (B, conv2_out * LSTM_hidden_size)
    max_err = float(jnp.max(jnp.abs(out - ref)))
    # Tolerance covers bf16 MXU operands (f32 accumulation) in the input projection,
    # the recurrent h@W_hh, the conv path, and the approx-reciprocal softmax.
    assert jnp.allclose(out, ref, atol=3e-2, rtol=3e-2), (
        f"mismatch: max abs err {max_err}")

    print("KERNEL_OK")
</pallas_src>

<mosaic_0001>
module attributes {stable_mosaic.version = 11 : i64} {
  func.func @kernel(%arg0: i32, %arg1: memref<2x8xi32, #tpu.memory_space<smem>>, %arg2: memref<50x32xf32, #tpu.memory_space<vmem>>, %arg3: memref<32x128xbf16, #tpu.memory_space<vmem>>, %arg4: memref<32x128xbf16, #tpu.memory_space<vmem>>, %arg5: memref<1x128xf32, #tpu.memory_space<vmem>>, %arg6: memref<32x16xbf16, #tpu.memory_space<vmem>>, %arg7: memref<1x16xf32, #tpu.memory_space<vmem>>, %arg8: memref<16x2xbf16, #tpu.memory_space<vmem>>, %arg9: memref<1x2xf32, #tpu.memory_space<vmem>>, %arg10: memref<2x64xf32, #tpu.memory_space<vmem>>) attributes {dimension_semantics = [#tpu.dimension_semantics<parallel>], iteration_bounds = array<i64: 1>, scalar_prefetch = 1 : i64, scratch_operands = 0 : i64, tpu.core_type = #tpu.core_type<tc>, window_params = [{pipeline_mode = #tpu.pipeline_mode<synchronous>, transform_indices = @transform_0, window_bounds = array<i64: 50, 32>}, {pipeline_mode = #tpu.pipeline_mode<synchronous>, transform_indices = @transform_1, window_bounds = array<i64: 32, 128>}, {pipeline_mode = #tpu.pipeline_mode<synchronous>, transform_indices = @transform_2, window_bounds = array<i64: 32, 128>}, {pipeline_mode = #tpu.pipeline_mode<synchronous>, transform_indices = @transform_3, window_bounds = array<i64: 1, 128>}, {pipeline_mode = #tpu.pipeline_mode<synchronous>, transform_indices = @transform_4, window_bounds = array<i64: 32, 16>}, {pipeline_mode = #tpu.pipeline_mode<synchronous>, transform_indices = @transform_5, window_bounds = array<i64: 1, 16>}, {pipeline_mode = #tpu.pipeline_mode<synchronous>, transform_indices = @transform_6, window_bounds = array<i64: 16, 2>}, {pipeline_mode = #tpu.pipeline_mode<synchronous>, transform_indices = @transform_7, window_bounds = array<i64: 1, 2>}, {transform_indices = @transform_8, window_bounds = array<i64: 2, 64>}]} {
    %c2_i32 = arith.constant 2 : i32
    %0 = arith.muli %arg0, %c2_i32 : i32
    %c0_i32 = arith.constant 0 : i32
    %1 = arith.addi %0, %c0_i32 : i32
    %2 = arith.index_cast %1 : i32 to index
    %c0 = arith.constant 0 : index
    %3 = memref.load %arg1[%2, %c0] : memref<2x8xi32, #tpu.memory_space<smem>>
    %4 = arith.index_cast %3 : i32 to index
    %c0_0 = arith.constant 0 : index
    %5 = vector.load %arg2[%4, %c0_0] : memref<50x32xf32, #tpu.memory_space<vmem>>, vector<1x32xf32>
    %c1_i32 = arith.constant 1 : i32
    %6 = arith.addi %0, %c1_i32 : i32
    %7 = arith.index_cast %6 : i32 to index
    %c0_1 = arith.constant 0 : index
    %8 = memref.load %arg1[%7, %c0_1] : memref<2x8xi32, #tpu.memory_space<smem>>
    %9 = arith.index_cast %8 : i32 to index
    %c0_2 = arith.constant 0 : index
    %10 = vector.load %arg2[%9, %c0_2] : memref<50x32xf32, #tpu.memory_space<vmem>>, vector<1x32xf32>
    %c0_i32_3 = arith.constant 0 : i32
    %11 = arith.addi %0, %c0_i32_3 : i32
    %12 = arith.index_cast %11 : i32 to index
    %c1 = arith.constant 1 : index
    %13 = memref.load %arg1[%12, %c1] : memref<2x8xi32, #tpu.memory_space<smem>>
    %14 = arith.index_cast %13 : i32 to index
    %c0_4 = arith.constant 0 : index
    %15 = vector.load %arg2[%14, %c0_4] : memref<50x32xf32, #tpu.memory_space<vmem>>, vector<1x32xf32>
    %c1_i32_5 = arith.constant 1 : i32
    %16 = arith.addi %0, %c1_i32_5 : i32
    %17 = arith.index_cast %16 : i32 to index
    %c1_6 = arith.constant 1 : index
    %18 = memref.load %arg1[%17, %c1_6] : memref<2x8xi32, #tpu.memory_space<smem>>
    %19 = arith.index_cast %18 : i32 to index
    %c0_7 = arith.constant 0 : index
    %20 = vector.load %arg2[%19, %c0_7] : memref<50x32xf32, #tpu.memory_space<vmem>>, vector<1x32xf32>
    %c0_i32_8 = arith.constant 0 : i32
    %21 = arith.addi %0, %c0_i32_8 : i32
    %22 = arith.index_cast %21 : i32 to index
    %c2 = arith.constant 2 : index
    %23 = memref.load %arg1[%22, %c2] : memref<2x8xi32, #tpu.memory_space<smem>>
    %24 = arith.index_cast %23 : i32 to index
    %c0_9 = arith.constant 0 : index
    %25 = vector.load %arg2[%24, %c0_9] : memref<50x32xf32, #tpu.memory_space<vmem>>, vector<1x32xf32>
    %c1_i32_10 = arith.constant 1 : i32
    %26 = arith.addi %0, %c1_i32_10 : i32
    %27 = arith.index_cast %26 : i32 to index
    %c2_11 = arith.constant 2 : index
    %28 = memref.load %arg1[%27, %c2_11] : memref<2x8xi32, #tpu.memory_space<smem>>
    %29 = arith.index_cast %28 : i32 to index
    %c0_12 = arith.constant 0 : index
    %30 = vector.load %arg2[%29, %c0_12] : memref<50x32xf32, #tpu.memory_space<vmem>>, vector<1x32xf32>
    %c0_i32_13 = arith.constant 0 : i32
    %31 = arith.addi %0, %c0_i32_13 : i32
    %32 = arith.index_cast %31 : i32 to index
    %c3 = arith.constant 3 : index
    %33 = memref.load %arg1[%32, %c3] : memref<2x8xi32, #tpu.memory_space<smem>>
    %34 = arith.index_cast %33 : i32 to index
    %c0_14 = arith.constant 0 : index
    %35 = vector.load %arg2[%34, %c0_14] : memref<50x32xf32, #tpu.memory_space<vmem>>, vector<1x32xf32>
    %c1_i32_15 = arith.constant 1 : i32
    %36 = arith.addi %0, %c1_i32_15 : i32
    %37 = arith.index_cast %36 : i32 to index
    %c3_16 = arith.constant 3 : index
    %38 = memref.load %arg1[%37, %c3_16] : memref<2x8xi32, #tpu.memory_space<smem>>
    %39 = arith.index_cast %38 : i32 to index
    %c0_17 = arith.constant 0 : index
    %40 = vector.load %arg2[%39, %c0_17] : memref<50x32xf32, #tpu.memory_space<vmem>>, vector<1x32xf32>
    %c0_i32_18 = arith.constant 0 : i32
    %41 = arith.addi %0, %c0_i32_18 : i32
    %42 = arith.index_cast %41 : i32 to index
    %c4 = arith.constant 4 : index
    %43 = memref.load %arg1[%42, %c4] : memref<2x8xi32, #tpu.memory_space<smem>>
    %44 = arith.index_cast %43 : i32 to index
    %c0_19 = arith.constant 0 : index
    %45 = vector.load %arg2[%44, %c0_19] : memref<50x32xf32, #tpu.memory_space<vmem>>, vector<1x32xf32>
    %c1_i32_20 = arith.constant 1 : i32
    %46 = arith.addi %0, %c1_i32_20 : i32
    %47 = arith.index_cast %46 : i32 to index
    %c4_21 = arith.constant 4 : index
    %48 = memref.load %arg1[%47, %c4_21] : memref<2x8xi32, #tpu.memory_space<smem>>
    %49 = arith.index_cast %48 : i32 to index
    %c0_22 = arith.constant 0 : index
    %50 = vector.load %arg2[%49, %c0_22] : memref<50x32xf32, #tpu.memory_space<vmem>>, vector<1x32xf32>
    %c0_i32_23 = arith.constant 0 : i32
    %51 = arith.addi %0, %c0_i32_23 : i32
    %52 = arith.index_cast %51 : i32 to index
    %c5 = arith.constant 5 : index
    %53 = memref.load %arg1[%52, %c5] : memref<2x8xi32, #tpu.memory_space<smem>>
    %54 = arith.index_cast %53 : i32 to index
    %c0_24 = arith.constant 0 : index
    %55 = vector.load %arg2[%54, %c0_24] : memref<50x32xf32, #tpu.memory_space<vmem>>, vector<1x32xf32>
    %c1_i32_25 = arith.constant 1 : i32
    %56 = arith.addi %0, %c1_i32_25 : i32
    %57 = arith.index_cast %56 : i32 to index
    %c5_26 = arith.constant 5 : index
    %58 = memref.load %arg1[%57, %c5_26] : memref<2x8xi32, #tpu.memory_space<smem>>
    %59 = arith.index_cast %58 : i32 to index
    %c0_27 = arith.constant 0 : index
    %60 = vector.load %arg2[%59, %c0_27] : memref<50x32xf32, #tpu.memory_space<vmem>>, vector<1x32xf32>
    %c0_i32_28 = arith.constant 0 : i32
    %61 = arith.addi %0, %c0_i32_28 : i32
    %62 = arith.index_cast %61 : i32 to index
    %c6 = arith.constant 6 : index
    %63 = memref.load %arg1[%62, %c6] : memref<2x8xi32, #tpu.memory_space<smem>>
    %64 = arith.index_cast %63 : i32 to index
    %c0_29 = arith.constant 0 : index
    %65 = vector.load %arg2[%64, %c0_29] : memref<50x32xf32, #tpu.memory_space<vmem>>, vector<1x32xf32>
    %c1_i32_30 = arith.constant 1 : i32
    %66 = arith.addi %0, %c1_i32_30 : i32
    %67 = arith.index_cast %66 : i32 to index
    %c6_31 = arith.constant 6 : index
    %68 = memref.load %arg1[%67, %c6_31] : memref<2x8xi32, #tpu.memory_space<smem>>
    %69 = arith.index_cast %68 : i32 to index
    %c0_32 = arith.constant 0 : index
    %70 = vector.load %arg2[%69, %c0_32] : memref<50x32xf32, #tpu.memory_space<vmem>>, vector<1x32xf32>
    %c0_i32_33 = arith.constant 0 : i32
    %71 = arith.addi %0, %c0_i32_33 : i32
    %72 = arith.index_cast %71 : i32 to index
    %c7 = arith.constant 7 : index
    %73 = memref.load %arg1[%72, %c7] : memref<2x8xi32, #tpu.memory_space<smem>>
    %74 = arith.index_cast %73 : i32 to index
    %c0_34 = arith.constant 0 : index
    %75 = vector.load %arg2[%74, %c0_34] : memref<50x32xf32, #tpu.memory_space<vmem>>, vector<1x32xf32>
    %c1_i32_35 = arith.constant 1 : i32
    %76 = arith.addi %0, %c1_i32_35 : i32
    %77 = arith.index_cast %76 : i32 to index
    %c7_36 = arith.constant 7 : index
    %78 = memref.load %arg1[%77, %c7_36] : memref<2x8xi32, #tpu.memory_space<smem>>
    %79 = arith.index_cast %78 : i32 to index
    %c0_37 = arith.constant 0 : index
    %80 = vector.load %arg2[%79, %c0_37] : memref<50x32xf32, #tpu.memory_space<vmem>>, vector<1x32xf32>
    %81 = tpu.concatenate %5, %10, %15, %20, %25, %30, %35, %40, %45, %50, %55, %60, %65, %70, %75, %80 in 0 : vector<1x32xf32>, vector<1x32xf32>, vector<1x32xf32>, vector<1x32xf32>, vector<1x32xf32>, vector<1x32xf32>, vector<1x32xf32>, vector<1x32xf32>, vector<1x32xf32>, vector<1x32xf32>, vector<1x32xf32>, vector<1x32xf32>, vector<1x32xf32>, vector<1x32xf32>, vector<1x32xf32>, vector<1x32xf32> -> vector<16x32xf32>
    %82 = arith.truncf %81 : vector<16x32xf32> to vector<16x32xbf16>
    %c0_38 = arith.constant 0 : index
    %c0_39 = arith.constant 0 : index
    %83 = vector.load %arg3[%c0_38, %c0_39] : memref<32x128xbf16, #tpu.memory_space<vmem>>, vector<32x128xbf16>
    %cst = arith.constant dense<0.000000e+00> : vector<16x128xf32>
    %84 = tpu.matmul %82, %83, %cst {dimension_numbers = #tpu.dot_dimension_numbers<[1], [0], [0], [1], [0, 0, 1, 1], [], []>} : vector<16x32xbf16>, vector<32x128xbf16>, vector<16x128xf32> -> vector<16x128xf32>
    %c0_40 = arith.constant 0 : index
    %c0_41 = arith.constant 0 : index
    %85 = vector.load %arg5[%c0_40, %c0_41] : memref<1x128xf32, #tpu.memory_space<vmem>>, vector<1x128xf32>
    %86 = vector.broadcast %85 : vector<1x128xf32> to vector<16x128xf32>
    %87 = arith.addf %84, %86 : vector<16x128xf32>
    %c0_42 = arith.constant 0 : index
    %c0_43 = arith.constant 0 : index
    %88 = vector.load %arg4[%c0_42, %c0_43] : memref<32x128xbf16, #tpu.memory_space<vmem>>, vector<32x128xbf16>
    %cst_44 = arith.constant 0.000000e+00 : f32
    %89 = vector.broadcast %cst_44 : f32 to vector<2x32xf32>
    %cst_45 = arith.constant 0.000000e+00 : f32
    %90 = vector.broadcast %cst_45 : f32 to vector<2x32xf32>
    %91 = vector.extract_strided_slice %87 {offsets = [0, 0], sizes = [2, 128], strides = [1, 1]} : vector<16x128xf32> to vector<2x128xf32>
    %92 = arith.truncf %89 : vector<2x32xf32> to vector<2x32xbf16>
    %cst_46 = arith.constant dense<0.000000e+00> : vector<2x128xf32>
    %93 = tpu.matmul %92, %88, %cst_46 {dimension_numbers = #tpu.dot_dimension_numbers<[1], [0], [0], [1], [0, 0, 1, 1], [], []>} : vector<2x32xbf16>, vector<32x128xbf16>, vector<2x128xf32> -> vector<2x128xf32>
    %94 = arith.addf %91, %93 : vector<2x128xf32>
    %95 = vector.extract_strided_slice %94 {offsets = [0, 0], sizes = [2, 96], strides = [1, 1]} : vector<2x128xf32> to vector<2x96xf32>
    %96 = arith.negf %95 : vector<2x96xf32>
    %97 = math.exp %96 : vector<2x96xf32>
    %cst_47 = arith.constant 1.000000e+00 : f32
    %98 = vector.broadcast %cst_47 : f32 to vector<2x96xf32>
    %99 = arith.addf %98, %97 : vector<2x96xf32>
    %100 = arith.divf %98, %99 : vector<2x96xf32>
    %101 = vector.extract_strided_slice %100 {offsets = [0, 0], sizes = [2, 32], strides = [1, 1]} : vector<2x96xf32> to vector<2x32xf32>
    %102 = vector.extract_strided_slice %100 {offsets = [0, 32], sizes = [2, 32], strides = [1, 1]} : vector<2x96xf32> to vector<2x32xf32>
    %103 = vector.extract_strided_slice %100 {offsets = [0, 64], sizes = [2, 32], strides = [1, 1]} : vector<2x96xf32> to vector<2x32xf32>
    %104 = vector.extract_strided_slice %94 {offsets = [0, 96], sizes = [2, 32], strides = [1, 1]} : vector<2x128xf32> to vector<2x32xf32>
    %105 = math.tanh %104 : vector<2x32xf32>
    %106 = arith.mulf %102, %90 : vector<2x32xf32>
    %107 = arith.mulf %101, %105 : vector<2x32xf32>
    %108 = arith.addf %106, %107 : vector<2x32xf32>
    %109 = math.tanh %108 : vector<2x32xf32>
    %110 = arith.mulf %103, %109 : vector<2x32xf32>
    %111 = vector.extract_strided_slice %87 {offsets = [2, 0], sizes = [2, 128], strides = [1, 1]} : vector<16x128xf32> to vector<2x128xf32>
    %112 = arith.truncf %110 : vector<2x32xf32> to vector<2x32xbf16>
    %cst_48 = arith.constant dense<0.000000e+00> : vector<2x128xf32>
    %113 = tpu.matmul %112, %88, %cst_48 {dimension_numbers = #tpu.dot_dimension_numbers<[1], [0], [0], [1], [0, 0, 1, 1], [], []>} : vector<2x32xbf16>, vector<32x128xbf16>, vector<2x128xf32> -> vector<2x128xf32>
    %114 = arith.addf %111, %113 : vector<2x128xf32>
    %115 = vector.extract_strided_slice %114 {offsets = [0, 0], sizes = [2, 96], strides = [1, 1]} : vector<2x128xf32> to vector<2x96xf32>
    %116 = arith.negf %115 : vector<2x96xf32>
    %117 = math.exp %116 : vector<2x96xf32>
    %cst_49 = arith.constant 1.000000e+00 : f32
    %118 = vector.broadcast %cst_49 : f32 to vector<2x96xf32>
    %119 = arith.addf %118, %117 : vector<2x96xf32>
    %120 = arith.divf %118, %119 : vector<2x96xf32>
    %121 = vector.extract_strided_slice %120 {offsets = [0, 0], sizes = [2, 32], strides = [1, 1]} : vector<2x96xf32> to vector<2x32xf32>
    %122 = vector.extract_strided_slice %120 {offsets = [0, 32], sizes = [2, 32], strides = [1, 1]} : vector<2x96xf32> to vector<2x32xf32>
    %123 = vector.extract_strided_slice %120 {offsets = [0, 64], sizes = [2, 32], strides = [1, 1]} : vector<2x96xf32> to vector<2x32xf32>
    %124 = vector.extract_strided_slice %114 {offsets = [0, 96], sizes = [2, 32], strides = [1, 1]} : vector<2x128xf32> to vector<2x32xf32>
    %125 = math.tanh %124 : vector<2x32xf32>
    %126 = arith.mulf %122, %108 : vector<2x32xf32>
    %127 = arith.mulf %121, %125 : vector<2x32xf32>
    %128 = arith.addf %126, %127 : vector<2x32xf32>
    %129 = math.tanh %128 : vector<2x32xf32>
    %130 = arith.mulf %123, %129 : vector<2x32xf32>
    %131 = vector.extract_strided_slice %87 {offsets = [4, 0], sizes = [2, 128], strides = [1, 1]} : vector<16x128xf32> to vector<2x128xf32>
    %132 = arith.truncf %130 : vector<2x32xf32> to vector<2x32xbf16>
    %cst_50 = arith.constant dense<0.000000e+00> : vector<2x128xf32>
    %133 = tpu.matmul %132, %88, %cst_50 {dimension_numbers = #tpu.dot_dimension_numbers<[1], [0], [0], [1], [0, 0, 1, 1], [], []>} : vector<2x32xbf16>, vector<32x128xbf16>, vector<2x128xf32> -> vector<2x128xf32>
    %134 = arith.addf %131, %133 : vector<2x128xf32>
    %135 = vector.extract_strided_slice %134 {offsets = [0, 0], sizes = [2, 96], strides = [1, 1]} : vector<2x128xf32> to vector<2x96xf32>
    %136 = arith.negf %135 : vector<2x96xf32>
    %137 = math.exp %136 : vector<2x96xf32>
    %cst_51 = arith.constant 1.000000e+00 : f32
    %138 = vector.broadcast %cst_51 : f32 to vector<2x96xf32>
    %139 = arith.addf %138, %137 : vector<2x96xf32>
    %140 = arith.divf %138, %139 : vector<2x96xf32>
    %141 = vector.extract_strided_slice %140 {offsets = [0, 0], sizes = [2, 32], strides = [1, 1]} : vector<2x96xf32> to vector<2x32xf32>
    %142 = vector.extract_strided_slice %140 {offsets = [0, 32], sizes = [2, 32], strides = [1, 1]} : vector<2x96xf32> to vector<2x32xf32>
    %143 = vector.extract_strided_slice %140 {offsets = [0, 64], sizes = [2, 32], strides = [1, 1]} : vector<2x96xf32> to vector<2x32xf32>
    %144 = vector.extract_strided_slice %134 {offsets = [0, 96], sizes = [2, 32], strides = [1, 1]} : vector<2x128xf32> to vector<2x32xf32>
    %145 = math.tanh %144 : vector<2x32xf32>
    %146 = arith.mulf %142, %128 : vector<2x32xf32>
    %147 = arith.mulf %141, %145 : vector<2x32xf32>
    %148 = arith.addf %146, %147 : vector<2x32xf32>
    %149 = math.tanh %148 : vector<2x32xf32>
    %150 = arith.mulf %143, %149 : vector<2x32xf32>
    %151 = vector.extract_strided_slice %87 {offsets = [6, 0], sizes = [2, 128], strides = [1, 1]} : vector<16x128xf32> to vector<2x128xf32>
    %152 = arith.truncf %150 : vector<2x32xf32> to vector<2x32xbf16>
    %cst_52 = arith.constant dense<0.000000e+00> : vector<2x128xf32>
    %153 = tpu.matmul %152, %88, %cst_52 {dimension_numbers = #tpu.dot_dimension_numbers<[1], [0], [0], [1], [0, 0, 1, 1], [], []>} : vector<2x32xbf16>, vector<32x128xbf16>, vector<2x128xf32> -> vector<2x128xf32>
    %154 = arith.addf %151, %153 : vector<2x128xf32>
    %155 = vector.extract_strided_slice %154 {offsets = [0, 0], sizes = [2, 96], strides = [1, 1]} : vector<2x128xf32> to vector<2x96xf32>
    %156 = arith.negf %155 : vector<2x96xf32>
    %157 = math.exp %156 : vector<2x96xf32>
    %cst_53 = arith.constant 1.000000e+00 : f32
    %158 = vector.broadcast %cst_53 : f32 to vector<2x96xf32>
    %159 = arith.addf %158, %157 : vector<2x96xf32>
    %160 = arith.divf %158, %159 : vector<2x96xf32>
    %161 = vector.extract_strided_slice %160 {offsets = [0, 0], sizes = [2, 32], strides = [1, 1]} : vector<2x96xf32> to vector<2x32xf32>
    %162 = vector.extract_strided_slice %160 {offsets = [0, 32], sizes = [2, 32], strides = [1, 1]} : vector<2x96xf32> to vector<2x32xf32>
    %163 = vector.extract_strided_slice %160 {offsets = [0, 64], sizes = [2, 32], strides = [1, 1]} : vector<2x96xf32> to vector<2x32xf32>
    %164 = vector.extract_strided_slice %154 {offsets = [0, 96], sizes = [2, 32], strides = [1, 1]} : vector<2x128xf32> to vector<2x32xf32>
    %165 = math.tanh %164 : vector<2x32xf32>
    %166 = arith.mulf %162, %148 : vector<2x32xf32>
    %167 = arith.mulf %161, %165 : vector<2x32xf32>
    %168 = arith.addf %166, %167 : vector<2x32xf32>
    %169 = math.tanh %168 : vector<2x32xf32>
    %170 = arith.mulf %163, %169 : vector<2x32xf32>
    %171 = vector.extract_strided_slice %87 {offsets = [8, 0], sizes = [2, 128], strides = [1, 1]} : vector<16x128xf32> to vector<2x128xf32>
    %172 = arith.truncf %170 : vector<2x32xf32> to vector<2x32xbf16>
    %cst_54 = arith.constant dense<0.000000e+00> : vector<2x128xf32>
    %173 = tpu.matmul %172, %88, %cst_54 {dimension_numbers = #tpu.dot_dimension_numbers<[1], [0], [0], [1], [0, 0, 1, 1], [], []>} : vector<2x32xbf16>, vector<32x128xbf16>, vector<2x128xf32> -> vector<2x128xf32>
    %174 = arith.addf %171, %173 : vector<2x128xf32>
    %175 = vector.extract_strided_slice %174 {offsets = [0, 0], sizes = [2, 96], strides = [1, 1]} : vector<2x128xf32> to vector<2x96xf32>
    %176 = arith.negf %175 : vector<2x96xf32>
    %177 = math.exp %176 : vector<2x96xf32>
    %cst_55 = arith.constant 1.000000e+00 : f32
    %178 = vector.broadcast %cst_55 : f32 to vector<2x96xf32>
    %179 = arith.addf %178, %177 : vector<2x96xf32>
    %180 = arith.divf %178, %179 : vector<2x96xf32>
    %181 = vector.extract_strided_slice %180 {offsets = [0, 0], sizes = [2, 32], strides = [1, 1]} : vector<2x96xf32> to vector<2x32xf32>
    %182 = vector.extract_strided_slice %180 {offsets = [0, 32], sizes = [2, 32], strides = [1, 1]} : vector<2x96xf32> to vector<2x32xf32>
    %183 = vector.extract_strided_slice %180 {offsets = [0, 64], sizes = [2, 32], strides = [1, 1]} : vector<2x96xf32> to vector<2x32xf32>
    %184 = vector.extract_strided_slice %174 {offsets = [0, 96], sizes = [2, 32], strides = [1, 1]} : vector<2x128xf32> to vector<2x32xf32>
    %185 = math.tanh %184 : vector<2x32xf32>
    %186 = arith.mulf %182, %168 : vector<2x32xf32>
    %187 = arith.mulf %181, %185 : vector<2x32xf32>
    %188 = arith.addf %186, %187 : vector<2x32xf32>
    %189 = math.tanh %188 : vector<2x32xf32>
    %190 = arith.mulf %183, %189 : vector<2x32xf32>
    %191 = vector.extract_strided_slice %87 {offsets = [10, 0], sizes = [2, 128], strides = [1, 1]} : vector<16x128xf32> to vector<2x128xf32>
    %192 = arith.truncf %190 : vector<2x32xf32> to vector<2x32xbf16>
    %cst_56 = arith.constant dense<0.000000e+00> : vector<2x128xf32>
    %193 = tpu.matmul %192, %88, %cst_56 {dimension_numbers = #tpu.dot_dimension_numbers<[1], [0], [0], [1], [0, 0, 1, 1], [], []>} : vector<2x32xbf16>, vector<32x128xbf16>, vector<2x128xf32> -> vector<2x128xf32>
    %194 = arith.addf %191, %193 : vector<2x128xf32>
    %195 = vector.extract_strided_slice %194 {offsets = [0, 0], sizes = [2, 96], strides = [1, 1]} : vector<2x128xf32> to vector<2x96xf32>
    %196 = arith.negf %195 : vector<2x96xf32>
    %197 = math.exp %196 : vector<2x96xf32>
    %cst_57 = arith.constant 1.000000e+00 : f32
    %198 = vector.broadcast %cst_57 : f32 to vector<2x96xf32>
    %199 = arith.addf %198, %197 : vector<2x96xf32>
    %200 = arith.divf %198, %199 : vector<2x96xf32>
    %201 = vector.extract_strided_slice %200 {offsets = [0, 0], sizes = [2, 32], strides = [1, 1]} : vector<2x96xf32> to vector<2x32xf32>
    %202 = vector.extract_strided_slice %200 {offsets = [0, 32], sizes = [2, 32], strides = [1, 1]} : vector<2x96xf32> to vector<2x32xf32>
    %203 = vector.extract_strided_slice %200 {offsets = [0, 64], sizes = [2, 32], strides = [1, 1]} : vector<2x96xf32> to vector<2x32xf32>
    %204 = vector.extract_strided_slice %194 {offsets = [0, 96], sizes = [2, 32], strides = [1, 1]} : vector<2x128xf32> to vector<2x32xf32>
    %205 = math.tanh %204 : vector<2x32xf32>
    %206 = arith.mulf %202, %188 : vector<2x32xf32>
    %207 = arith.mulf %201, %205 : vector<2x32xf32>
    %208 = arith.addf %206, %207 : vector<2x32xf32>
    %209 = math.tanh %208 : vector<2x32xf32>
    %210 = arith.mulf %203, %209 : vector<2x32xf32>
    %211 = vector.extract_strided_slice %87 {offsets = [12, 0], sizes = [2, 128], strides = [1, 1]} : vector<16x128xf32> to vector<2x128xf32>
    %212 = arith.truncf %210 : vector<2x32xf32> to vector<2x32xbf16>
    %cst_58 = arith.constant dense<0.000000e+00> : vector<2x128xf32>
    %213 = tpu.matmul %212, %88, %cst_58 {dimension_numbers = #tpu.dot_dimension_numbers<[1], [0], [0], [1], [0, 0, 1, 1], [], []>} : vector<2x32xbf16>, vector<32x128xbf16>, vector<2x128xf32> -> vector<2x128xf32>
    %214 = arith.addf %211, %213 : vector<2x128xf32>
    %215 = vector.extract_strided_slice %214 {offsets = [0, 0], sizes = [2, 96], strides = [1, 1]} : vector<2x128xf32> to vector<2x96xf32>
    %216 = arith.negf %215 : vector<2x96xf32>
    %217 = math.exp %216 : vector<2x96xf32>
    %cst_59 = arith.constant 1.000000e+00 : f32
    %218 = vector.broadcast %cst_59 : f32 to vector<2x96xf32>
    %219 = arith.addf %218, %217 : vector<2x96xf32>
    %220 = arith.divf %218, %219 : vector<2x96xf32>
    %221 = vector.extract_strided_slice %220 {offsets = [0, 0], sizes = [2, 32], strides = [1, 1]} : vector<2x96xf32> to vector<2x32xf32>
    %222 = vector.extract_strided_slice %220 {offsets = [0, 32], sizes = [2, 32], strides = [1, 1]} : vector<2x96xf32> to vector<2x32xf32>
    %223 = vector.extract_strided_slice %220 {offsets = [0, 64], sizes = [2, 32], strides = [1, 1]} : vector<2x96xf32> to vector<2x32xf32>
    %224 = vector.extract_strided_slice %214 {offsets = [0, 96], sizes = [2, 32], strides = [1, 1]} : vector<2x128xf32> to vector<2x32xf32>
    %225 = math.tanh %224 : vector<2x32xf32>
    %226 = arith.mulf %222, %208 : vector<2x32xf32>
    %227 = arith.mulf %221, %225 : vector<2x32xf32>
    %228 = arith.addf %226, %227 : vector<2x32xf32>
    %229 = math.tanh %228 : vector<2x32xf32>
    %230 = arith.mulf %223, %229 : vector<2x32xf32>
    %231 = vector.extract_strided_slice %87 {offsets = [14, 0], sizes = [2, 128], strides = [1, 1]} : vector<16x128xf32> to vector<2x128xf32>
    %232 = arith.truncf %230 : vector<2x32xf32> to vector<2x32xbf16>
    %cst_60 = arith.constant dense<0.000000e+00> : vector<2x128xf32>
    %233 = tpu.matmul %232, %88, %cst_60 {dimension_numbers = #tpu.dot_dimension_numbers<[1], [0], [0], [1], [0, 0, 1, 1], [], []>} : vector<2x32xbf16>, vector<32x128xbf16>, vector<2x128xf32> -> vector<2x128xf32>
    %234 = arith.addf %231, %233 : vector<2x128xf32>
    %235 = vector.extract_strided_slice %234 {offsets = [0, 0], sizes = [2, 96], strides = [1, 1]} : vector<2x128xf32> to vector<2x96xf32>
    %236 = arith.negf %235 : vector<2x96xf32>
    %237 = math.exp %236 : vector<2x96xf32>
    %cst_61 = arith.constant 1.000000e+00 : f32
    %238 = vector.broadcast %cst_61 : f32 to vector<2x96xf32>
    %239 = arith.addf %238, %237 : vector<2x96xf32>
    %240 = arith.divf %238, %239 : vector<2x96xf32>
    %241 = vector.extract_strided_slice %240 {offsets = [0, 0], sizes = [2, 32], strides = [1, 1]} : vector<2x96xf32> to vector<2x32xf32>
    %242 = vector.extract_strided_slice %240 {offsets = [0, 32], sizes = [2, 32], strides = [1, 1]} : vector<2x96xf32> to vector<2x32xf32>
    %243 = vector.extract_strided_slice %240 {offsets = [0, 64], sizes = [2, 32], strides = [1, 1]} : vector<2x96xf32> to vector<2x32xf32>
    %244 = vector.extract_strided_slice %234 {offsets = [0, 96], sizes = [2, 32], strides = [1, 1]} : vector<2x128xf32> to vector<2x32xf32>
    %245 = math.tanh %244 : vector<2x32xf32>
    %246 = arith.mulf %242, %228 : vector<2x32xf32>
    %247 = arith.mulf %241, %245 : vector<2x32xf32>
    %248 = arith.addf %246, %247 : vector<2x32xf32>
    %249 = math.tanh %248 : vector<2x32xf32>
    %250 = arith.mulf %243, %249 : vector<2x32xf32>
    %251 = tpu.concatenate %110, %130, %150, %170, %190, %210, %230, %250 in 0 : vector<2x32xf32>, vector<2x32xf32>, vector<2x32xf32>, vector<2x32xf32>, vector<2x32xf32>, vector<2x32xf32>, vector<2x32xf32>, vector<2x32xf32> -> vector<16x32xf32>
    %252 = arith.truncf %251 : vector<16x32xf32> to vector<16x32xbf16>
    %c0_62 = arith.constant 0 : index
    %c0_63 = arith.constant 0 : index
    %253 = vector.load %arg6[%c0_62, %c0_63] : memref<32x16xbf16, #tpu.memory_space<vmem>>, vector<32x16xbf16>
    %cst_64 = arith.constant dense<0.000000e+00> : vector<16x16xf32>
    %254 = tpu.matmul %252, %253, %cst_64 {dimension_numbers = #tpu.dot_dimension_numbers<[1], [0], [0], [1], [0, 0, 1, 1], [], []>} : vector<16x32xbf16>, vector<32x16xbf16>, vector<16x16xf32> -> vector<16x16xf32>
    %c0_65 = arith.constant 0 : index
    %c0_66 = arith.constant 0 : index
    %255 = vector.load %arg7[%c0_65, %c0_66] : memref<1x16xf32, #tpu.memory_space<vmem>>, vector<1x16xf32>
    %256 = vector.broadcast %255 : vector<1x16xf32> to vector<16x16xf32>
    %257 = arith.addf %254, %256 : vector<16x16xf32>
    %cst_67 = arith.constant 0.000000e+00 : f32
    %258 = vector.broadcast %cst_67 : f32 to vector<16x16xf32>
    %259 = arith.maximumf %257, %258 : vector<16x16xf32>
    %260 = arith.truncf %259 : vector<16x16xf32> to vector<16x16xbf16>
    %c0_68 = arith.constant 0 : index
    %c0_69 = arith.constant 0 : index
    %261 = vector.load %arg8[%c0_68, %c0_69] : memref<16x2xbf16, #tpu.memory_space<vmem>>, vector<16x2xbf16>
    %cst_70 = arith.constant dense<0.000000e+00> : vector<16x2xf32>
    %262 = tpu.matmul %260, %261, %cst_70 {dimension_numbers = #tpu.dot_dimension_numbers<[1], [0], [0], [1], [0, 0, 1, 1], [], []>} : vector<16x16xbf16>, vector<16x2xbf16>, vector<16x2xf32> -> vector<16x2xf32>
    %c0_71 = arith.constant 0 : index
    %c0_72 = arith.constant 0 : index
    %263 = vector.load %arg9[%c0_71, %c0_72] : memref<1x2xf32, #tpu.memory_space<vmem>>, vector<1x2xf32>
    %264 = vector.broadcast %263 : vector<1x2xf32> to vector<16x2xf32>
    %265 = arith.addf %262, %264 : vector<16x2xf32>
    %266 = vector.extract_strided_slice %265 {offsets = [0, 0], sizes = [2, 2], strides = [1, 1]} : vector<16x2xf32> to vector<2x2xf32>
    %267 = vector.extract_strided_slice %265 {offsets = [2, 0], sizes = [2, 2], strides = [1, 1]} : vector<16x2xf32> to vector<2x2xf32>
    %268 = vector.extract_strided_slice %265 {offsets = [4, 0], sizes = [2, 2], strides = [1, 1]} : vector<16x2xf32> to vector<2x2xf32>
    %269 = vector.extract_strided_slice %265 {offsets = [6, 0], sizes = [2, 2], strides = [1, 1]} : vector<16x2xf32> to vector<2x2xf32>
    %270 = vector.extract_strided_slice %265 {offsets = [8, 0], sizes = [2, 2], strides = [1, 1]} : vector<16x2xf32> to vector<2x2xf32>
    %271 = vector.extract_strided_slice %265 {offsets = [10, 0], sizes = [2, 2], strides = [1, 1]} : vector<16x2xf32> to vector<2x2xf32>
    %272 = vector.extract_strided_slice %265 {offsets = [12, 0], sizes = [2, 2], strides = [1, 1]} : vector<16x2xf32> to vector<2x2xf32>
    %273 = vector.extract_strided_slice %265 {offsets = [14, 0], sizes = [2, 2], strides = [1, 1]} : vector<16x2xf32> to vector<2x2xf32>
    %274 = arith.maximumf %266, %267 : vector<2x2xf32>
    %275 = arith.maximumf %274, %268 : vector<2x2xf32>
    %276 = arith.maximumf %275, %269 : vector<2x2xf32>
    %277 = arith.maximumf %276, %270 : vector<2x2xf32>
    %278 = arith.maximumf %277, %271 : vector<2x2xf32>
    %279 = arith.maximumf %278, %272 : vector<2x2xf32>
    %280 = arith.maximumf %279, %273 : vector<2x2xf32>
    %281 = arith.subf %266, %280 : vector<2x2xf32>
    %282 = math.exp %281 : vector<2x2xf32>
    %283 = arith.subf %267, %280 : vector<2x2xf32>
    %284 = math.exp %283 : vector<2x2xf32>
    %285 = arith.subf %268, %280 : vector<2x2xf32>
    %286 = math.exp %285 : vector<2x2xf32>
    %287 = arith.subf %269, %280 : vector<2x2xf32>
    %288 = math.exp %287 : vector<2x2xf32>
    %289 = arith.subf %270, %280 : vector<2x2xf32>
    %290 = math.exp %289 : vector<2x2xf32>
    %291 = arith.subf %271, %280 : vector<2x2xf32>
    %292 = math.exp %291 : vector<2x2xf32>
    %293 = arith.subf %272, %280 : vector<2x2xf32>
    %294 = math.exp %293 : vector<2x2xf32>
    %295 = arith.subf %273, %280 : vector<2x2xf32>
    %296 = math.exp %295 : vector<2x2xf32>
    %297 = arith.addf %282, %284 : vector<2x2xf32>
    %298 = arith.addf %297, %286 : vector<2x2xf32>
    %299 = arith.addf %298, %288 : vector<2x2xf32>
    %300 = arith.addf %299, %290 : vector<2x2xf32>
    %301 = arith.addf %300, %292 : vector<2x2xf32>
    %302 = arith.addf %301, %294 : vector<2x2xf32>
    %303 = arith.addf %302, %296 : vector<2x2xf32>
    %304 = tpu.reciprocal %303 {approx = true} : vector<2x2xf32> -> vector<2x2xf32>
    %305 = arith.mulf %282, %304 : vector<2x2xf32>
    %306 = arith.mulf %284, %304 : vector<2x2xf32>
    %307 = arith.mulf %286, %304 : vector<2x2xf32>
    %308 = arith.mulf %288, %304 : vector<2x2xf32>
    %309 = arith.mulf %290, %304 : vector<2x2xf32>
    %310 = arith.mulf %292, %304 : vector<2x2xf32>
    %311 = arith.mulf %294, %304 : vector<2x2xf32>
    %312 = arith.mulf %296, %304 : vector<2x2xf32>
    %313 = vector.extract_strided_slice %305 {offsets = [0, 0], sizes = [2, 1], strides = [1, 1]} : vector<2x2xf32> to vector<2x1xf32>
    %314 = vector.broadcast %313 : vector<2x1xf32> to vector<2x32xf32>
    %315 = arith.mulf %314, %110 : vector<2x32xf32>
    %316 = vector.extract_strided_slice %306 {offsets = [0, 0], sizes = [2, 1], strides = [1, 1]} : vector<2x2xf32> to vector<2x1xf32>
    %317 = vector.broadcast %316 : vector<2x1xf32> to vector<2x32xf32>
    %318 = arith.mulf %317, %130 : vector<2x32xf32>
    %319 = arith.addf %315, %318 : vector<2x32xf32>
    %320 = vector.extract_strided_slice %307 {offsets = [0, 0], sizes = [2, 1], strides = [1, 1]} : vector<2x2xf32> to vector<2x1xf32>
    %321 = vector.broadcast %320 : vector<2x1xf32> to vector<2x32xf32>
    %322 = arith.mulf %321, %150 : vector<2x32xf32>
    %323 = arith.addf %319, %322 : vector<2x32xf32>
    %324 = vector.extract_strided_slice %308 {offsets = [0, 0], sizes = [2, 1], strides = [1, 1]} : vector<2x2xf32> to vector<2x1xf32>
    %325 = vector.broadcast %324 : vector<2x1xf32> to vector<2x32xf32>
    %326 = arith.mulf %325, %170 : vector<2x32xf32>
    %327 = arith.addf %323, %326 : vector<2x32xf32>
    %328 = vector.extract_strided_slice %309 {offsets = [0, 0], sizes = [2, 1], strides = [1, 1]} : vector<2x2xf32> to vector<2x1xf32>
    %329 = vector.broadcast %328 : vector<2x1xf32> to vector<2x32xf32>
    %330 = arith.mulf %329, %190 : vector<2x32xf32>
    %331 = arith.addf %327, %330 : vector<2x32xf32>
    %332 = vector.extract_strided_slice %310 {offsets = [0, 0], sizes = [2, 1], strides = [1, 1]} : vector<2x2xf32> to vector<2x1xf32>
    %333 = vector.broadcast %332 : vector<2x1xf32> to vector<2x32xf32>
    %334 = arith.mulf %333, %210 : vector<2x32xf32>
    %335 = arith.addf %331, %334 : vector<2x32xf32>
    %336 = vector.extract_strided_slice %311 {offsets = [0, 0], sizes = [2, 1], strides = [1, 1]} : vector<2x2xf32> to vector<2x1xf32>
    %337 = vector.broadcast %336 : vector<2x1xf32> to vector<2x32xf32>
    %338 = arith.mulf %337, %230 : vector<2x32xf32>
    %339 = arith.addf %335, %338 : vector<2x32xf32>
    %340 = vector.extract_strided_slice %312 {offsets = [0, 0], sizes = [2, 1], strides = [1, 1]} : vector<2x2xf32> to vector<2x1xf32>
    %341 = vector.broadcast %340 : vector<2x1xf32> to vector<2x32xf32>
    %342 = arith.mulf %341, %250 : vector<2x32xf32>
    %343 = arith.addf %339, %342 : vector<2x32xf32>
    %344 = vector.extract_strided_slice %305 {offsets = [0, 1], sizes = [2, 1], strides = [1, 1]} : vector<2x2xf32> to vector<2x1xf32>
    %345 = vector.broadcast %344 : vector<2x1xf32> to vector<2x32xf32>
    %346 = arith.mulf %345, %110 : vector<2x32xf32>
    %347 = vector.extract_strided_slice %306 {offsets = [0, 1], sizes = [2, 1], strides = [1, 1]} : vector<2x2xf32> to vector<2x1xf32>
    %348 = vector.broadcast %347 : vector<2x1xf32> to vector<2x32xf32>
    %349 = arith.mulf %348, %130 : vector<2x32xf32>
    %350 = arith.addf %346, %349 : vector<2x32xf32>
    %351 = vector.extract_strided_slice %307 {offsets = [0, 1], sizes = [2, 1], strides = [1, 1]} : vector<2x2xf32> to vector<2x1xf32>
    %352 = vector.broadcast %351 : vector<2x1xf32> to vector<2x32xf32>
    %353 = arith.mulf %352, %150 : vector<2x32xf32>
    %354 = arith.addf %350, %353 : vector<2x32xf32>
    %355 = vector.extract_strided_slice %308 {offsets = [0, 1], sizes = [2, 1], strides = [1, 1]} : vector<2x2xf32> to vector<2x1xf32>
    %356 = vector.broadcast %355 : vector<2x1xf32> to vector<2x32xf32>
    %357 = arith.mulf %356, %170 : vector<2x32xf32>
    %358 = arith.addf %354, %357 : vector<2x32xf32>
    %359 = vector.extract_strided_slice %309 {offsets = [0, 1], sizes = [2, 1], strides = [1, 1]} : vector<2x2xf32> to vector<2x1xf32>
    %360 = vector.broadcast %359 : vector<2x1xf32> to vector<2x32xf32>
    %361 = arith.mulf %360, %190 : vector<2x32xf32>
    %362 = arith.addf %358, %361 : vector<2x32xf32>
    %363 = vector.extract_strided_slice %310 {offsets = [0, 1], sizes = [2, 1], strides = [1, 1]} : vector<2x2xf32> to vector<2x1xf32>
    %364 = vector.broadcast %363 : vector<2x1xf32> to vector<2x32xf32>
    %365 = arith.mulf %364, %210 : vector<2x32xf32>
    %366 = arith.addf %362, %365 : vector<2x32xf32>
    %367 = vector.extract_strided_slice %311 {offsets = [0, 1], sizes = [2, 1], strides = [1, 1]} : vector<2x2xf32> to vector<2x1xf32>
    %368 = vector.broadcast %367 : vector<2x1xf32> to vector<2x32xf32>
    %369 = arith.mulf %368, %230 : vector<2x32xf32>
    %370 = arith.addf %366, %369 : vector<2x32xf32>
    %371 = vector.extract_strided_slice %312 {offsets = [0, 1], sizes = [2, 1], strides = [1, 1]} : vector<2x2xf32> to vector<2x1xf32>
    %372 = vector.broadcast %371 : vector<2x1xf32> to vector<2x32xf32>
    %373 = arith.mulf %372, %250 : vector<2x32xf32>
    %374 = arith.addf %370, %373 : vector<2x32xf32>
    %375 = tpu.concatenate %343, %374 in 1 : vector<2x32xf32>, vector<2x32xf32> -> vector<2x64xf32>
    %c0_73 = arith.constant 0 : index
    %c0_74 = arith.constant 0 : index
    %376 = vector.load %arg10[%c0_73, %c0_74] : memref<2x64xf32, #tpu.memory_space<vmem>>, vector<2x64xf32>
    tpu.vector_store %arg10[%c0_73, %c0_74], %375 {strides = array<i32>} : memref<2x64xf32, #tpu.memory_space<vmem>>, vector<2x64xf32>,
    return
  }
  func.func @transform_0(%arg0: i32, %arg1: memref<2x8xi32, #tpu.memory_space<smem>>) -> (i32, i32) {
    %c0_i32 = arith.constant 0 : i32
    %c0_i32_0 = arith.constant 0 : i32
    %c0_i32_1 = arith.constant 0 : i32
    return %c0_i32, %c0_i32_0 : i32, i32
  }
  func.func @transform_1(%arg0: i32, %arg1: memref<2x8xi32, #tpu.memory_space<smem>>) -> (i32, i32) {
    %c0_i32 = arith.constant 0 : i32
    %c0_i32_0 = arith.constant 0 : i32
    %c0_i32_1 = arith.constant 0 : i32
    return %c0_i32, %c0_i32_0 : i32, i32
  }
  func.func @transform_2(%arg0: i32, %arg1: memref<2x8xi32, #tpu.memory_space<smem>>) -> (i32, i32) {
    %c0_i32 = arith.constant 0 : i32
    %c0_i32_0 = arith.constant 0 : i32
    %c0_i32_1 = arith.constant 0 : i32
    return %c0_i32, %c0_i32_0 : i32, i32
  }
  func.func @transform_3(%arg0: i32, %arg1: memref<2x8xi32, #tpu.memory_space<smem>>) -> (i32, i32) {
    %c0_i32 = arith.constant 0 : i32
    %c0_i32_0 = arith.constant 0 : i32
    %c0_i32_1 = arith.constant 0 : i32
    return %c0_i32, %c0_i32_0 : i32, i32
  }
  func.func @transform_4(%arg0: i32, %arg1: memref<2x8xi32, #tpu.memory_space<smem>>) -> (i32, i32) {
    %c0_i32 = arith.constant 0 : i32
    %c0_i32_0 = arith.constant 0 : i32
    %c0_i32_1 = arith.constant 0 : i32
    return %c0_i32, %c0_i32_0 : i32, i32
  }
  func.func @transform_5(%arg0: i32, %arg1: memref<2x8xi32, #tpu.memory_space<smem>>) -> (i32, i32) {
    %c0_i32 = arith.constant 0 : i32
    %c0_i32_0 = arith.constant 0 : i32
    %c0_i32_1 = arith.constant 0 : i32
    return %c0_i32, %c0_i32_0 : i32, i32
  }
  func.func @transform_6(%arg0: i32, %arg1: memref<2x8xi32, #tpu.memory_space<smem>>) -> (i32, i32) {
    %c0_i32 = arith.constant 0 : i32
    %c0_i32_0 = arith.constant 0 : i32
    %c0_i32_1 = arith.constant 0 : i32
    return %c0_i32, %c0_i32_0 : i32, i32
  }
  func.func @transform_7(%arg0: i32, %arg1: memref<2x8xi32, #tpu.memory_space<smem>>) -> (i32, i32) {
    %c0_i32 = arith.constant 0 : i32
    %c0_i32_0 = arith.constant 0 : i32
    %c0_i32_1 = arith.constant 0 : i32
    return %c0_i32, %c0_i32_0 : i32, i32
  }
  func.func @transform_8(%arg0: i32, %arg1: memref<2x8xi32, #tpu.memory_space<smem>>) -> (i32, i32) {
    %c0_i32 = arith.constant 0 : i32
    %c0_i32_0 = arith.constant 0 : i32
    return %arg0, %c0_i32 : i32, i32
  }
}

</mosaic_0001>

<bundles_post_ra>
// kernel: tpu_custom_call.1
= control target key start
LH: loop header
LB: loop body
LE: loop exit
PB: predicated region body
PF: predicated region fallthrough
CT: control target
= control target key end

     0   :  { %s1965_s0 = inlined_call_operand.vmem [shape: s32[2,8], index: 0, kind: input, shape index: {}]   ;;  %s1966_s1 = inlined_call_operand.vmem [shape: f32[50,32], index: 1, kind: input, shape index: {}]   ;;  %s1967_s2 = inlined_call_operand.vmem [shape: bf16[32,128], index: 2, kind: input, shape index: {}]   ;;  %s1968_s3 = inlined_call_operand.vmem [shape: bf16[32,128], index: 3, kind: input, shape index: {}]   ;;  %s1969_s4 = inlined_call_operand.vmem [shape: f32[1,128], index: 4, kind: input, shape index: {}]   ;;  %s1970_s5 = inlined_call_operand.vmem [shape: bf16[32,16], index: 5, kind: input, shape index: {}]   ;;  %s1971_s6 = inlined_call_operand.vmem [shape: f32[1,16], index: 6, kind: input, shape index: {}]   ;;  %s1972_s7 = inlined_call_operand.vmem [shape: bf16[16,2], index: 7, kind: input, shape index: {}]   ;;  %s1973_s8 = inlined_call_operand.vmem [shape: f32[1,2], index: 8, kind: input, shape index: {}]   ;;  %s1974_s9 = inlined_call_operand.hbm [shape: f32[2,64], index: 9, kind: output, shape index: {}]  }
   0x1   :  { %s14_s11 = sshll.u32 %s1965_s0, 4  ;;  %s15_s11 = int_to_ptr.vmem [resolvable:$true] %s14_s11 }
   0x2   :  { %s1549_s12 = scalar_lea.vmem %s15_s11, 32  ;;  %p1554_p1 = scmp.lt.s32.totalorder %s15_s11, %s15_s11 }
   0x3   :  { %p1550_p0 = scmp.ne.s32.totalorder %s15_s11, %s1549_s12  ;;  %p1555_p2 = scmp.lt.s32.totalorder %s1549_s12, %s1549_s12 }
   0x5   :  { %p1556_p3 = por %p1555_p2, %p1554_p1 }
   0x7   :  { %p1557_p4 = pnand %p1556_p3, %p1550_p0 }
   0x9   :  { %1560 = shalt.err (!%p1557_p4)  }
   0xa   :  { %s1587_s13 = smov [#allocation3]  }
   0xb   :  { %17 = dma.vmem_to_smem %s15_s11, 32, %s1587_s13, [#allocation2] }
   0xc   :  { %1583 = dma.done.wait [#allocation2], 32 }
   0xd   :  { %1584 = vsyncadd [#allocation2], 4294967264 }
   0xe   :  { %19 = sfence }
   0xf   :  { %v1652_v0 = vld [vmem:[%s1968_s3] sm:$0xff]   ;;  %v1588_v1 = vmov 0.0   ;;  %v1663_v3 = vld [vmem:[%s1968_s3 + $0x8] sm:$0xff]   ;;  %vm1589_vm0 = vmmov 0   ;;  %s40_s21 = sld [smem:[#allocation3]]  ;;  %s1674_s3 = sld [smem:[#allocation3 + $0x1]] }
  0x10   :  { %1363 = vmatprep.subr.bf16.mxu1 %v1588_v1  ;;  %1355 = vmatprep.subr.bf16.mxu0 %v1588_v1  ;;  %v1461_v2 = vld [vmem:[%s1967_s2] sm:$0xff]   ;;  %v1463_v4 = vld [vmem:[%s1967_s2 + $0x8] sm:$0xff]   ;;  %s1280_s22 = sld [smem:[#allocation3 + $0x80]]  ;;  %s1676_s23 = sld [smem:[#allocation3 + $0x81]]  ;;  %v1590_v5 = vmov 0   ;;  %vm146_vm1 = vcmask 1040384  }
  0x11   :  { %1364 = vmatpush3.bf16.msra.mxu1 %v1652_v0  ;;  %1367 = vmatprep.mubr.msk.bf16.mxu1 %vm1589_vm0, %v1588_v1  ;;  %s1681_s24 = sld [smem:[#allocation3 + $0x2]]  ;;  %s1685_s25 = sld [smem:[#allocation3 + $0x3]]  ;;  %vm148_vm2 = vcmask 1041408   ;;  %vm150_vm3 = vcmask 1042432   ;;  %vm152_vm4 = vcmask 1043456   ;;  %vm154_vm5 = vcmask 1044480  }
  0x12   :  { %1356 = vmatpush3.bf16.msra.mxu0 %v1461_v2  ;;  %1365 = vmatprep.subr.bf16.mxu1 %v1588_v1  ;;  %s1683_s2 = sld [smem:[#allocation3 + $0x82]]  ;;  %s1687_s26 = sld [smem:[#allocation3 + $0x83]] }
  0x13   :  { %1357 = vmatprep.subr.bf16.mxu0 %v1588_v1  ;;  %1359 = vmatprep.mubr.msk.bf16.mxu0 %vm1589_vm0, %v1588_v1  ;;  %s1690_s27 = sld [smem:[#allocation3 + $0x4]]  ;;  %s1696_s29 = sld [smem:[#allocation3 + $0x5]] }
  0x14   :  { %1452 = vset.pattern.permute.xlu0 %v1590_v5  ;;  %1450 = vset.pattern.permute.xlu1 %v1590_v5  ;;  %s1692_s28 = sld [smem:[#allocation3 + $0x84]]  ;;  %s1698_s30 = sld [smem:[#allocation3 + $0x85]] }
  0x15   :  { %1366 = vmatpush3.bf16.msra.mxu1 %v1663_v3  ;;  %s41_s12 = scalar_lea.vmem %s1966_s1, %s40_s21  ;;  %s50_s17 = scalar_lea.vmem %s1966_s1, %s1674_s3 }
  0x16   :  { %1358 = vmatpush3.bf16.msra.mxu0 %v1463_v4  ;;  %1379 = vmatprep.subr.bf16.mxu1 %v1588_v1  ;;  %s46_s15 = scalar_lea.vmem %s1966_s1, %s1280_s22  ;;  %v42_v6 = vld [vmem:[%s41_s12] sm:$0x1]  ;;  %s54_s20 = scalar_lea.vmem %s1966_s1, %s1676_s23 }
  0x17   :  { %1371 = vmatprep.subr.bf16.mxu0 %v1588_v1  ;;  %v47_v7 = vld [vmem:[%s46_s15] sm:$0x1]  ;;  %s58_s10 = scalar_lea.vmem %s1966_s1, %s1681_s24  ;;  %s66_s14 = scalar_lea.vmem %s1966_s1, %s1685_s25 }
  0x18   :  { %1368 = vmatmul.mubr.bf16.vlgmr.msra.gmra.mrb[0].mxu1 %v1590_v5  ;;  %v51_v8 = vld [vmem:[%s50_s17] sm:$0x1]  ;;  %s62_s13 = scalar_lea.vmem %s1966_s1, %s1683_s2  ;;  %v105_v10 = vrot.slane %v47_v7, 7  ;;  %s1291_s11 = sld [smem:[#allocation3 + $0x6]] }
  0x19   :  { %1380 = vmatpush3.bf16.msra.mxu1 %v1652_v0  ;;  %1383 = vmatprep.mubr.msk.bf16.mxu1 %vm1589_vm0, %v1588_v1  ;;  %v55_v9 = vld [vmem:[%s54_s20] sm:$0x1]  ;;  %v108_v13 = vrot.slane %v51_v8, 6  ;;  %s74_s24 = scalar_lea.vmem %s1966_s1, %s1690_s27  ;;  %s82_s19 = scalar_lea.vmem %s1966_s1, %s1696_s29 }
  0x1a   :  { %1381 = vmatprep.subr.bf16.mxu1 %v1588_v1  ;;  %v59_v11 = vld [vmem:[%s58_s10] sm:$0x1]  ;;  %v111_v14 = vrot.slane %v55_v9, 5  ;;  %s78_s2 = scalar_lea.vmem %s1966_s1, %s1692_s28  ;;  %v147_v16 = vsel %vm146_vm1, %v42_v6, %v105_v10  ;;  %s86_s27 = scalar_lea.vmem %s1966_s1, %s1698_s30 }
  0x1b   :  { %v63_v12 = vld [vmem:[%s62_s13] sm:$0x1]  ;;  %v114_v15 = vrot.slane %v59_v11, 4  ;;  %v149_v21 = vsel %vm148_vm2, %v147_v16, %v108_v13  ;;  %s70_s10 = scalar_lea.vmem %s1966_s1, %s1687_s26  ;;  %s1292_s29 = sld [smem:[#allocation3 + $0x86]] }
  0x1c   :  { %v67_v17 = vld [vmem:[%s66_s14] sm:$0x1]  ;;  %v117_v20 = vrot.slane %v63_v12, 3  ;;  %v151_v24 = vsel %vm150_vm3, %v149_v21, %v111_v14  ;;  %s1293_s12 = sld [smem:[#allocation3 + $0x7]] }
  0x1d   :  { %1382 = vmatpush3.bf16.msra.mxu1 %v1663_v3  ;;  %v75_v18 = vld [vmem:[%s74_s24] sm:$0x1]  ;;  %s1294_s30 = sld [smem:[#allocation3 + $0x87]]  ;;  %v153_v27 = vsel %vm152_vm4, %v151_v24, %v114_v15 }
  0x1e   :  { %v79_v19 = vld [vmem:[%s78_s2] sm:$0x1]  ;;  %1395 = vmatprep.subr.bf16.mxu1 %v1588_v1 }
  0x1f   :  { %v83_v22 = vld [vmem:[%s82_s19] sm:$0x1]  ;;  %v126_v25 = vrot.slane %v79_v19, 7 }
  0x20   :  { %v87_v23 = vld [vmem:[%s86_s27] sm:$0x1]  ;;  %v129_v26 = vrot.slane %v83_v22, 6 }
  0x21   :  { %20 = vsyncpa [#allocation5], 0  ;;  %v132_v28 = vrot.slane %v87_v23, 5  ;;  %v160_v29 = vsel %vm146_vm1, %v75_v18, %v126_v25  ;;  %v71_v30 = vld [vmem:[%s70_s10] sm:$0x1]  ;;  %v120_v31 = vrot.slane %v67_v17, 2  ;;  %v155_v33 = vsel %vm154_vm5, %v153_v27, %v117_v20  ;;  %s90_s3 = scalar_lea.vmem %s1966_s1, %s1291_s11  ;;  %s94_s15 = scalar_lea.vmem %s1966_s1, %s1292_s29 }
  0x22   :  { %v161_v32 = vsel %vm148_vm2, %v160_v29, %v129_v26  ;;  %vm156_vm6 = vcmask 1045504   ;;  %v91_v34 = vld [vmem:[%s90_s3] sm:$0x1]  ;;  %s98_s16 = scalar_lea.vmem %s1966_s1, %s1293_s12  ;;  %v123_v35 = vrot.slane %v71_v30, 1  ;;  %vm158_vm7 = vcmask 1046528   ;;  %s1591_s19 = smov 32  }
  0x23   :  { %v162_v36 = vsel %vm150_vm3, %v161_v32, %v132_v28  ;;  %v95_v37 = vld [vmem:[%s94_s15] sm:$0x1]  ;;  %s102_s25 = scalar_lea.vmem %s1966_s1, %s1294_s30  ;;  %v135_v39 = vrot.slane %v91_v34, 4  ;;  %v157_v40 = vsel %vm156_vm6, %v155_v33, %v120_v31  ;;  %vm191_vm8 = vcmask 261120  }
  0x24   :  { %v99_v38 = vld [vmem:[%s98_s16] sm:$0x1]  ;;  %v138_v42 = vrot.slane %v95_v37, 3  ;;  %v159_v46 = vsel %vm158_vm7, %v157_v40, %v123_v35  ;;  %vm963_vm9 = vcmask 130048   ;;  %vm1248_vm10 = vcmask 517120  }
  0x25   :  { %v103_v41 = vld [vmem:[%s102_s25] sm:$0x1]  ;;  %v141_v43 = vrot.slane %v99_v38, 2  ;;  %v163_v45 = vsel %vm152_vm4, %v162_v36, %v135_v39 }
  0x26   :  { %v144_v44 = vrot.slane %v103_v41, 1  ;;  %v164_v47 = vsel %vm154_vm5, %v163_v45, %v138_v42  ;;  %v1295_v55 = vld [vmem:[%s1969_s4] ss:$0 sm:$0xff]  ;;  %s1592_s4 = smov 64  }
  0x27   :  { %v165_v48 = vsel %vm156_vm6, %v164_v47, %v141_v43 }
  0x28   :  { %v166_v49 = vsel %vm158_vm7, %v165_v48, %v144_v44 }
  0x29   :  { %v167_v50 = vpack.c.bf16 %v166_v49, %v159_v46 }
  0x2b   :  { %1360 = vmatmul.mubr.msk.bf16.vlgmr.msra.gmra.mrb[0].mxu0 %vm191_vm8, %v167_v50 }
  0x2c   :  { %1372 = vmatpush3.bf16.msra.mxu0 %v1652_v0  ;;  %1375 = vmatprep.mubr.msk.bf16.mxu0 %vm1589_vm0, %v1588_v1 }
  0x2d   :  { %1373 = vmatprep.subr.bf16.mxu0 %v1588_v1 }
  0x30   :  { %1374 = vmatpush3.bf16.msra.mxu0 %v1663_v3 }
  0x31   :  { %1387 = vmatprep.subr.bf16.mxu0 %v1588_v1 }
  0xeb   :  { %v289_v51 = vpop.f32.mrb[0].mxu1 }
  0xec   :  { %v1369_v52 = vpop.f32.mrb[1].mxu1 }
  0xed   :  { %v292_v53 = vpop.f32.mrb[2].mxu1 }
  0xee   :  { %v1370_v54 = vpop.f32.mrb[3].mxu1 }
  0xfe   :  { %v229_v56 = vpop.f32.mrb[0].mxu0 }
  0xff   :  { %v1786_v57 = vadd.f32 %v1295_v55, %v229_v56  ;;  %v1361_v58 = vpop.f32.mrb[1].mxu0 }
 0x100   :  { %v232_v59 = vpop.f32.mrb[2].mxu0 }
 0x101   :  { %v295_v60 = vadd.f32 %v289_v51, %v1786_v57  ;;  %v1789_v61 = vadd.f32 %v1295_v55, %v232_v59  ;;  %v1362_v62 = vpop.f32.mrb[3].mxu0 }
 0x103   :  { %1467 = vtanh.f32 %v295_v60  ;;  %v1301_v2 = vmul.f32 -1.442695, %v295_v60 }
 0x105   :  { %1469 = vpow2.f32 %v1301_v2 }
 0x10d   :  { %v1468_v63 = vpop.eup %1467 }
 0x10e   :  { %305 = vrot.lane.b32.xlu0 %v1468_v63, %s1591_s19 }
 0x10f   :  { %v1470_v4 = vpop.eup %1469 }
 0x110   :  { %v299_v6 = vadd.f32 1.0, %v1470_v4 }
 0x112   :  { %1471 = vrcp.f32 %v299_v6 }
 0x11c   :  { %v1472_v7 = vpop.eup %1471 }
 0x11d   :  { %v303_v10 = vmul.f32 0.0, %v1472_v7 }
 0x180   :  { %v306_v8 = vpop.permute.xlu0 %305 }
 0x181   :  { %v308_v9 = vmul.f32 %v1472_v7, %v306_v8 }
 0x183   :  { %310 = vrot.lane.b32.xlu0 %v308_v9, %s1591_s19 }
 0x1f5   :  { %v311_v11 = vpop.permute.xlu0 %310 }
 0x1f6   :  { %v313_v12 = vadd.f32 %v311_v11, %v303_v10 }
 0x1f8   :  { %1473 = vtanh.f32 %v313_v12  ;;  %v379_v31 = vrot.slane %v313_v12, 6 }
 0x202   :  { %v1474_v13 = vpop.eup %1473 }
 0x203   :  { %316 = vrot.lane.b32.xlu1 %v1474_v13, %s1591_s19 }
 0x275   :  { %v317_v14 = vpop.permute.xlu1 %316 }
 0x276   :  { %v1794_v15 = vmul.f32 %v1472_v7, %v317_v14 }
 0x278   :  { %v320_v16 = vpack.c.bf16 %v1794_v15, %v1794_v15 }
 0x27a   :  { %322 = vrot.lane.b32.xlu1 %v320_v16, %s1592_s4 }
 0x2ec   :  { %v323_v17 = vpop.permute.xlu1 %322 }
 0x2ed   :  { %1376 = vmatmul.mubr.msk.bf16.vlgmr.msra.gmra.mrb[4].mxu0 %vm191_vm8, %v323_v17 }
 0x2ee   :  { %1388 = vmatpush3.bf16.msra.mxu0 %v1652_v0  ;;  %1391 = vmatprep.mubr.msk.bf16.mxu0 %vm1589_vm0, %v1588_v1 }
 0x2ef   :  { %1389 = vmatprep.subr.bf16.mxu0 %v1588_v1 }
 0x2f2   :  { %1390 = vmatpush3.bf16.msra.mxu0 %v1663_v3 }
 0x2f3   :  { %1403 = vmatprep.subr.bf16.mxu0 %v1588_v1 }
 0x3c0   :  { %v361_v18 = vpop.f32.mrb[4].mxu0 }
 0x3c1   :  { %v368_v19 = vrot.slane %v361_v18, 6  ;;  %v1377_v20 = vpop.f32.mrb[5].mxu0 }
 0x3c2   :  { %v364_v21 = vpop.f32.mrb[6].mxu0 }
 0x3c3   :  { %v370_v22 = vadd.f32 %v368_v19, %v1786_v57  ;;  %v1378_v23 = vpop.f32.mrb[7].mxu0 }
 0x3c5   :  { %1475 = vtanh.f32 %v370_v22  ;;  %v1303_v25 = vmul.f32 -1.442695, %v370_v22 }
 0x3c7   :  { %1477 = vpow2.f32 %v1303_v25 }
 0x3cf   :  { %v1476_v24 = vpop.eup %1475 }
 0x3d0   :  { %383 = vrot.lane.b32.xlu0 %v1476_v24, %s1591_s19 }
 0x3d1   :  { %v1478_v26 = vpop.eup %1477 }
 0x3d2   :  { %v374_v27 = vadd.f32 1.0, %v1478_v26 }
 0x3d4   :  { %1479 = vrcp.f32 %v374_v27 }
 0x3de   :  { %v1480_v28 = vpop.eup %1479 }
 0x3df   :  { %v381_v32 = vmul.f32 %v1480_v28, %v379_v31 }
 0x442   :  { %v384_v29 = vpop.permute.xlu0 %383 }
 0x443   :  { %v386_v30 = vmul.f32 %v1480_v28, %v384_v29 }
 0x445   :  { %388 = vrot.lane.b32.xlu1 %v386_v30, %s1591_s19 }
 0x4b7   :  { %v389_v33 = vpop.permute.xlu1 %388 }
 0x4b8   :  { %v391_v34 = vadd.f32 %v389_v33, %v381_v32 }
 0x4ba   :  { %1481 = vtanh.f32 %v391_v34  ;;  %v458_v54 = vrot.slane %v391_v34, 6 }
 0x4c4   :  { %v1482_v35 = vpop.eup %1481 }
 0x4c5   :  { %394 = vrot.lane.b32.xlu0 %v1482_v35, %s1591_s19 }
 0x537   :  { %v395_v36 = vpop.permute.xlu0 %394 }
 0x538   :  { %v1810_v37 = vmul.f32 %v1480_v28, %v395_v36 }
 0x53a   :  { %v398_v38 = vpack.c.bf16 %v1810_v37, %v1810_v37 }
 0x53c   :  { %v400_v39 = vrot.slane %v398_v38, 1 }
 0x53e   :  { %401 = vrot.lane.b32.xlu1 %v400_v39, %s1592_s4 }
 0x5b0   :  { %v402_v40 = vpop.permute.xlu1 %401 }
 0x5b1   :  { %1384 = vmatmul.mubr.msk.bf16.vlgmr.msra.gmra.mrb[4].mxu1 %vm191_vm8, %v402_v40 }
 0x5b2   :  { %1396 = vmatpush3.bf16.msra.mxu1 %v1652_v0  ;;  %1399 = vmatprep.mubr.msk.bf16.mxu1 %vm1589_vm0, %v1588_v1 }
 0x5b3   :  { %1397 = vmatprep.subr.bf16.mxu1 %v1588_v1 }
 0x5b6   :  { %1398 = vmatpush3.bf16.msra.mxu1 %v1663_v3 }
 0x5b7   :  { %1411 = vmatprep.subr.bf16.mxu1 %v1588_v1 }
 0x684   :  { %v440_v41 = vpop.f32.mrb[4].mxu1 }
 0x685   :  { %v447_v42 = vrot.slane %v440_v41, 4  ;;  %v1385_v43 = vpop.f32.mrb[5].mxu1 }
 0x686   :  { %v443_v44 = vpop.f32.mrb[6].mxu1 }
 0x687   :  { %v449_v45 = vadd.f32 %v447_v42, %v1786_v57  ;;  %v1386_v46 = vpop.f32.mrb[7].mxu1 }
 0x689   :  { %1483 = vtanh.f32 %v449_v45  ;;  %v1305_v48 = vmul.f32 -1.442695, %v449_v45 }
 0x68b   :  { %1485 = vpow2.f32 %v1305_v48 }
 0x693   :  { %v1484_v47 = vpop.eup %1483 }
 0x694   :  { %462 = vrot.lane.b32.xlu0 %v1484_v47, %s1591_s19 }
 0x695   :  { %v1486_v49 = vpop.eup %1485 }
 0x696   :  { %v453_v50 = vadd.f32 1.0, %v1486_v49 }
 0x698   :  { %1487 = vrcp.f32 %v453_v50 }
 0x6a2   :  { %v1488_v51 = vpop.eup %1487 }
 0x6a3   :  { %v460_v55 = vmul.f32 %v1488_v51, %v458_v54 }
 0x706   :  { %v463_v52 = vpop.permute.xlu0 %462 }
 0x707   :  { %v465_v53 = vmul.f32 %v1488_v51, %v463_v52 }
 0x709   :  { %467 = vrot.lane.b32.xlu1 %v465_v53, %s1591_s19 }
 0x77b   :  { %v468_v56 = vpop.permute.xlu1 %467 }
 0x77c   :  { %v470_v58 = vadd.f32 %v468_v56, %v460_v55 }
 0x77e   :  { %1489 = vtanh.f32 %v470_v58  ;;  %v537_v20 = vrot.slane %v470_v58, 6 }
 0x788   :  { %v1490_v59 = vpop.eup %1489 }
 0x789   :  { %473 = vrot.lane.b32.xlu0 %v1490_v59, %s1591_s19 }
 0x7fb   :  { %v474_v60 = vpop.permute.xlu0 %473 }
 0x7fc   :  { %v1826_v62 = vmul.f32 %v1488_v51, %v474_v60 }
 0x7fe   :  { %v477_v63 = vpack.c.bf16 %v1826_v62, %v1826_v62 }
 0x800   :  { %v479_v2 = vrot.slane %v477_v63, 2 }
 0x802   :  { %480 = vrot.lane.b32.xlu1 %v479_v2, %s1592_s4 }
 0x874   :  { %v481_v4 = vpop.permute.xlu1 %480 }
 0x875   :  { %1392 = vmatmul.mubr.msk.bf16.vlgmr.msra.gmra.mrb[8].mxu0 %vm191_vm8, %v481_v4 }
 0x876   :  { %1404 = vmatpush3.bf16.msra.mxu0 %v1652_v0  ;;  %1407 = vmatprep.mubr.msk.bf16.mxu0 %vm1589_vm0, %v1588_v1 }
 0x877   :  { %1405 = vmatprep.subr.bf16.mxu0 %v1588_v1 }
 0x87a   :  { %1406 = vmatpush3.bf16.msra.mxu0 %v1663_v3 }
 0x87b   :  { %1419 = vmatprep.subr.bf16.mxu0 %v1588_v1 }
 0x948   :  { %v519_v6 = vpop.f32.mrb[8].mxu0 }
 0x949   :  { %v526_v7 = vrot.slane %v519_v6, 2  ;;  %v1393_v8 = vpop.f32.mrb[9].mxu0 }
 0x94a   :  { %v522_v9 = vpop.f32.mrb[10].mxu0 }
 0x94b   :  { %v528_v10 = vadd.f32 %v526_v7, %v1786_v57  ;;  %v1394_v11 = vpop.f32.mrb[11].mxu0 }
 0x94d   :  { %1491 = vtanh.f32 %v528_v10  ;;  %v1307_v13 = vmul.f32 -1.442695, %v528_v10 }
 0x94f   :  { %1493 = vpow2.f32 %v1307_v13 }
 0x957   :  { %v1492_v12 = vpop.eup %1491 }
 0x958   :  { %541 = vrot.lane.b32.xlu0 %v1492_v12, %s1591_s19 }
 0x959   :  { %v1494_v14 = vpop.eup %1493 }
 0x95a   :  { %v532_v16 = vadd.f32 1.0, %v1494_v14 }
 0x95c   :  { %1495 = vrcp.f32 %v532_v16 }
 0x966   :  { %v1496_v17 = vpop.eup %1495 }
 0x967   :  { %v539_v21 = vmul.f32 %v1496_v17, %v537_v20 }
 0x9ca   :  { %v542_v18 = vpop.permute.xlu0 %541 }
 0x9cb   :  { %v544_v19 = vmul.f32 %v1496_v17, %v542_v18 }
 0x9cd   :  { %546 = vrot.lane.b32.xlu1 %v544_v19, %s1591_s19 }
 0xa3f   :  { %v547_v22 = vpop.permute.xlu1 %546 }
 0xa40   :  { %v549_v23 = vadd.f32 %v547_v22, %v539_v21 }
 0xa42   :  { %1497 = vtanh.f32 %v549_v23  ;;  %v613_v42 = vrot.slane %v549_v23, 6 }
 0xa4c   :  { %v1498_v57 = vpop.eup %1497 }
 0xa4d   :  { %552 = vrot.lane.b32.xlu0 %v1498_v57, %s1591_s19 }
 0xabf   :  { %v553_v24 = vpop.permute.xlu0 %552 }
 0xac0   :  { %v1842_v25 = vmul.f32 %v1496_v17, %v553_v24 }
 0xac2   :  { %v556_v26 = vpack.c.bf16 %v1842_v25, %v1842_v25 }
 0xac4   :  { %v558_v27 = vrot.slane %v556_v26, 3 }
 0xac6   :  { %559 = vrot.lane.b32.xlu1 %v558_v27, %s1592_s4 }
 0xb38   :  { %v560_v28 = vpop.permute.xlu1 %559 }
 0xb39   :  { %1400 = vmatmul.mubr.msk.bf16.vlgmr.msra.gmra.mrb[8].mxu1 %vm191_vm8, %v560_v28 }
 0xb3a   :  { %1412 = vmatpush3.bf16.msra.mxu1 %v1652_v0  ;;  %1415 = vmatprep.mubr.msk.bf16.mxu1 %vm1589_vm0, %v1588_v1 }
 0xb3b   :  { %1413 = vmatprep.subr.bf16.mxu1 %v1588_v1 }
 0xb3e   :  { %1414 = vmatpush3.bf16.msra.mxu1 %v1663_v3 }
 0xb3f   :  { %1427 = vmatprep.subr.bf16.mxu1 %v1588_v1 }
 0xc0c   :  { %v598_v29 = vpop.f32.mrb[8].mxu1 }
 0xc0d   :  { %v604_v30 = vadd.f32 %v598_v29, %v1789_v61  ;;  %v1401_v31 = vpop.f32.mrb[9].mxu1 }
 0xc0e   :  { %v601_v32 = vpop.f32.mrb[10].mxu1 }
 0xc0f   :  { %1499 = vtanh.f32 %v604_v30  ;;  %v1402_v33 = vpop.f32.mrb[11].mxu1  ;;  %v1309_v35 = vmul.f32 -1.442695, %v604_v30 }
 0xc11   :  { %1501 = vpow2.f32 %v1309_v35 }
 0xc19   :  { %v1500_v34 = vpop.eup %1499 }
 0xc1a   :  { %617 = vrot.lane.b32.xlu0 %v1500_v34, %s1591_s19 }
 0xc1b   :  { %v1502_v36 = vpop.eup %1501 }
 0xc1c   :  { %v608_v38 = vadd.f32 1.0, %v1502_v36 }
 0xc1e   :  { %1503 = vrcp.f32 %v608_v38 }
 0xc28   :  { %v1504_v39 = vpop.eup %1503 }
 0xc29   :  { %v615_v43 = vmul.f32 %v1504_v39, %v613_v42 }
 0xc8c   :  { %v618_v40 = vpop.permute.xlu0 %617 }
 0xc8d   :  { %v620_v41 = vmul.f32 %v1504_v39, %v618_v40 }
 0xc8f   :  { %622 = vrot.lane.b32.xlu1 %v620_v41, %s1591_s19 }
 0xd01   :  { %v623_v44 = vpop.permute.xlu1 %622 }
 0xd02   :  { %v625_v45 = vadd.f32 %v623_v44, %v615_v43 }
 0xd04   :  { %1505 = vtanh.f32 %v625_v45  ;;  %v691_v4 = vrot.slane %v625_v45, 6 }
 0xd0e   :  { %v1506_v46 = vpop.eup %1505 }
 0xd0f   :  { %628 = vrot.lane.b32.xlu0 %v1506_v46, %s1591_s19 }
 0xd81   :  { %v629_v47 = vpop.permute.xlu0 %628 }
 0xd82   :  { %v1858_v48 = vmul.f32 %v1504_v39, %v629_v47 }
 0xd84   :  { %v632_v49 = vpack.c.bf16 %v1858_v48, %v1858_v48 }
 0xd86   :  { %634 = vrot.lane.b32.xlu1 %v632_v49, %s1592_s4 }
 0xdf8   :  { %v635_v50 = vpop.permute.xlu1 %634 }
 0xdf9   :  { %1408 = vmatmul.mubr.msk.bf16.vlgmr.msra.gmra.mrb[12].mxu0 %vm191_vm8, %v635_v50 }
 0xdfa   :  { %1420 = vmatpush3.bf16.msra.mxu0 %v1652_v0  ;;  %1423 = vmatprep.mubr.msk.bf16.mxu0 %vm1589_vm0, %v1588_v1 }
 0xdfb   :  { %1421 = vmatprep.subr.bf16.mxu0 %v1588_v1 }
 0xdfe   :  { %1422 = vmatpush3.bf16.msra.mxu0 %v1663_v3 }
 0xdff   :  { %1435 = vmatprep.subr.bf16.mxu0 %v1588_v1 }
 0xecc   :  { %v673_v51 = vpop.f32.mrb[12].mxu0 }
 0xecd   :  { %v680_v52 = vrot.slane %v673_v51, 6  ;;  %v1409_v53 = vpop.f32.mrb[13].mxu0 }
 0xece   :  { %v676_v54 = vpop.f32.mrb[14].mxu0 }
 0xecf   :  { %v682_v55 = vadd.f32 %v680_v52, %v1789_v61  ;;  %v1410_v56 = vpop.f32.mrb[15].mxu0 }
 0xed1   :  { %1507 = vtanh.f32 %v682_v55  ;;  %v1311_v0 = vmul.f32 -1.442695, %v682_v55 }
 0xed3   :  { %1509 = vpow2.f32 %v1311_v0  ;;  %v1465_v0 = vld [vmem:[%s1970_s5 + $0x8] sm:$0xff]  }
 0xedb   :  { %v1508_v58 = vpop.eup %1507 }
 0xedc   :  { %695 = vrot.lane.b32.xlu0 %v1508_v58, %s1591_s19 }
 0xedd   :  { %v1510_v59 = vpop.eup %1509 }
 0xede   :  { %v686_v60 = vadd.f32 1.0, %v1510_v59 }
 0xee0   :  { %1511 = vrcp.f32 %v686_v60 }
 0xeea   :  { %v1512_v63 = vpop.eup %1511 }
 0xeeb   :  { %v693_v6 = vmul.f32 %v1512_v63, %v691_v4 }
 0xf4e   :  { %v696_v3 = vpop.permute.xlu0 %695 }
 0xf4f   :  { %v698_v2 = vmul.f32 %v1512_v63, %v696_v3 }
 0xf51   :  { %700 = vrot.lane.b32.xlu1 %v698_v2, %s1591_s19 }
 0xfc3   :  { %v701_v7 = vpop.permute.xlu1 %700 }
 0xfc4   :  { %v703_v8 = vadd.f32 %v701_v7, %v693_v6 }
 0xfc6   :  { %1513 = vtanh.f32 %v703_v8  ;;  %v770_v29 = vrot.slane %v703_v8, 6 }
 0xfd0   :  { %v1514_v9 = vpop.eup %1513 }
 0xfd1   :  { %706 = vrot.lane.b32.xlu0 %v1514_v9, %s1591_s19 }
0x1043   :  { %v707_v10 = vpop.permute.xlu0 %706 }
0x1044   :  { %v1874_v11 = vmul.f32 %v1512_v63, %v707_v10  ;;  %v868_v63 = vsel %vm148_vm2, %v1794_v15, %v1810_v37  ;;  %v1466_v10 = vld [vmem:[%s1972_s7] sm:$0xff]   ;;  %s1595_s7 = smov [#allocation4]  }
0x1045   :  { %v869_v4 = vsel %vm152_vm4, %v868_v63, %v1826_v62 }
0x1046   :  { %v710_v12 = vpack.c.bf16 %v1874_v11, %v1874_v11  ;;  %v871_v3 = vsel %vm148_vm2, %v1858_v48, %v1874_v11  ;;  %v870_v6 = vsel %vm156_vm6, %v869_v4, %v1842_v25 }
0x1048   :  { %v712_v13 = vrot.slane %v710_v12, 1  ;;  %v1316_v12 = vld [vmem:[%s1971_s6] ss:$0 sm:$0xff]  ;;  %s1594_s6 = smov 96  }
0x104a   :  { %713 = vrot.lane.b32.xlu1 %v712_v13, %s1592_s4 }
0x10bc   :  { %v714_v14 = vpop.permute.xlu1 %713 }
0x10bd   :  { %1416 = vmatmul.mubr.msk.bf16.vlgmr.msra.gmra.mrb[12].mxu1 %vm191_vm8, %v714_v14 }
0x10be   :  { %1431 = vmatprep.mubr.msk.bf16.mxu1 %vm1589_vm0, %v1588_v1 }
0x1190   :  { %v752_v16 = vpop.f32.mrb[12].mxu1 }
0x1191   :  { %v759_v17 = vrot.slane %v752_v16, 4  ;;  %v1417_v18 = vpop.f32.mrb[13].mxu1 }
0x1192   :  { %v755_v19 = vpop.f32.mrb[14].mxu1 }
0x1193   :  { %v761_v20 = vadd.f32 %v759_v17, %v1789_v61  ;;  %v1418_v21 = vpop.f32.mrb[15].mxu1 }
0x1195   :  { %1515 = vtanh.f32 %v761_v20  ;;  %v1313_v23 = vmul.f32 -1.442695, %v761_v20 }
0x1197   :  { %1517 = vpow2.f32 %v1313_v23  ;;  %v1320_v23 = vld [vmem:[%s1973_s8] ss:$0 sm:$0xff]  ;;  %s1256_s8 = sshll.u32 %s1595_s7, 4  ;;  %s1257_s8 = int_to_ptr.vmem [resolvable:$true] %s1256_s8 }
0x1198   :  { %s1561_s30 = scalar_lea.vmem %s1257_s8, 32  ;;  %p1566_p6 = scmp.lt.s32.totalorder %s1257_s8, %s1257_s8 }
0x1199   :  { %p1562_p5 = scmp.ne.s32.totalorder %s1257_s8, %s1561_s30  ;;  %p1567_p7 = scmp.lt.s32.totalorder %s1561_s30, %s1561_s30 }
0x119b   :  { %p1568_p8 = por %p1567_p7, %p1566_p6 }
0x119d   :  { %p1569_p9 = pnand %p1568_p8, %p1562_p5 }
0x119f   :  { %v1516_v22 = vpop.eup %1515 }
0x11a0   :  { %774 = vrot.lane.b32.xlu0 %v1516_v22, %s1591_s19 }
0x11a1   :  { %v1518_v57 = vpop.eup %1517 }
0x11a2   :  { %v765_v24 = vadd.f32 1.0, %v1518_v57 }
0x11a4   :  { %1519 = vrcp.f32 %v765_v24 }
0x11ae   :  { %v1520_v26 = vpop.eup %1519 }
0x11af   :  { %v772_v30 = vmul.f32 %v1520_v26, %v770_v29 }
0x1212   :  { %v775_v27 = vpop.permute.xlu0 %774 }
0x1213   :  { %v777_v28 = vmul.f32 %v1520_v26, %v775_v27 }
0x1215   :  { %779 = vrot.lane.b32.xlu1 %v777_v28, %s1591_s19 }
0x1287   :  { %v780_v31 = vpop.permute.xlu1 %779 }
0x1288   :  { %v782_v32 = vadd.f32 %v780_v31, %v772_v30 }
0x128a   :  { %1521 = vtanh.f32 %v782_v32  ;;  %v849_v54 = vrot.slane %v782_v32, 6 }
0x1294   :  { %v1522_v33 = vpop.eup %1521 }
0x1295   :  { %785 = vrot.lane.b32.xlu0 %v1522_v33, %s1591_s19 }
0x1307   :  { %v786_v34 = vpop.permute.xlu0 %785 }
0x1308   :  { %v1886_v35 = vmul.f32 %v1520_v26, %v786_v34 }
0x130a   :  { %v789_v36 = vpack.c.bf16 %v1886_v35, %v1886_v35 }
0x130c   :  { %v791_v38 = vrot.slane %v789_v36, 2 }
0x130e   :  { %792 = vrot.lane.b32.xlu1 %v791_v38, %s1592_s4 }
0x1380   :  { %v793_v39 = vpop.permute.xlu1 %792 }
0x1381   :  { %1424 = vmatmul.mubr.msk.bf16.vlgmr.msra.gmra.mrb[16].mxu0 %vm191_vm8, %v793_v39 }
0x1382   :  { %1437 = vmatprep.mubr.msk.bf16.mxu0 %vm1589_vm0, %v1588_v1  ;;  %1436 = vmatpush3.bf16.msra.mxu0 %v1466_v10 }
0x1454   :  { %v831_v40 = vpop.f32.mrb[16].mxu0 }
0x1455   :  { %v838_v41 = vrot.slane %v831_v40, 2  ;;  %v1425_v42 = vpop.f32.mrb[17].mxu0 }
0x1456   :  { %v834_v43 = vpop.f32.mrb[18].mxu0 }
0x1457   :  { %v840_v44 = vadd.f32 %v838_v41, %v1789_v61  ;;  %v1426_v45 = vpop.f32.mrb[19].mxu0  ;;  %v1464_v61 = vld [vmem:[%s1970_s5] sm:$0xff]  }
0x1458   :  { %1428 = vmatpush3.bf16.msra.mxu1 %v1464_v61 }
0x1459   :  { %1523 = vtanh.f32 %v840_v44  ;;  %v1315_v47 = vmul.f32 -1.442695, %v840_v44  ;;  %1429 = vmatprep.subr.bf16.mxu1 %v1588_v1  ;;  %v872_v1 = vsel %vm152_vm4, %v871_v3, %v1886_v35 }
0x145b   :  { %1525 = vpow2.f32 %v1315_v47 }
0x145c   :  { %1430 = vmatpush3.bf16.msra.mxu1 %v1465_v0 }
0x1463   :  { %v1524_v46 = vpop.eup %1523 }
0x1464   :  { %853 = vrot.lane.b32.xlu0 %v1524_v46, %s1591_s19 }
0x1465   :  { %v1526_v49 = vpop.eup %1525 }
0x1466   :  { %v844_v50 = vadd.f32 1.0, %v1526_v49 }
0x1468   :  { %1527 = vrcp.f32 %v844_v50 }
0x1472   :  { %v1528_v51 = vpop.eup %1527 }
0x1473   :  { %v851_v55 = vmul.f32 %v1528_v51, %v849_v54 }
0x14d6   :  { %v854_v52 = vpop.permute.xlu0 %853 }
0x14d7   :  { %v856_v53 = vmul.f32 %v1528_v51, %v854_v52 }
0x14d9   :  { %858 = vrot.lane.b32.xlu1 %v856_v53, %s1591_s19 }
0x154b   :  { %v859_v56 = vpop.permute.xlu1 %858 }
0x154c   :  { %v861_v58 = vadd.f32 %v859_v56, %v851_v55 }
0x154e   :  { %1529 = vtanh.f32 %v861_v58 }
0x1558   :  { %v1530_v59 = vpop.eup %1529 }
0x1559   :  { %864 = vrot.lane.b32.xlu0 %v1530_v59, %s1591_s19 }
0x15cb   :  { %v865_v60 = vpop.permute.xlu0 %864 }
0x15cc   :  { %v1911_v2 = vmul.f32 %v1528_v51, %v865_v60 }
0x15ce   :  { %v873_v7 = vsel %vm156_vm6, %v872_v1, %v1911_v2 }
0x15cf   :  { %v874_v8 = vpack.c.bf16 %v873_v7, %v870_v6 }
0x15d1   :  { %887 = vrot.lane.b32.xlu1 %v874_v8, %s1592_s4 }
0x1643   :  { %v888_v9 = vpop.permute.xlu1 %887 }
0x1644   :  { %1432 = vmatmul.mubr.msk.bf16.vlgmr.msra.gmra.mrb[16].mxu1 %vm191_vm8, %v888_v9 }
0x1717   :  { %v938_v13 = vpop.f32.mrb[16].mxu1 }
0x1718   :  { %v939_v14 = vadd.f32 %v1316_v12, %v938_v13  ;;  %v1433_v16 = vpop.f32.mrb[17].mxu1 }
0x1719   :  { %v941_v17 = vpop.f32.mrb[18].mxu1 }
0x171a   :  { %v942_v18 = vadd.f32 %v1316_v12, %v941_v17  ;;  %v1434_v19 = vpop.f32.mrb[19].mxu1  ;;  %v945_v20 = vmax.f32 %v939_v14, 0.0 }
0x171c   :  { %v946_v21 = vmax.f32 %v942_v18, 0.0 }
0x171e   :  { %v947_v22 = vpack.c.bf16 %v946_v21, %v945_v20 }
0x1720   :  { %1438 = vmatmul.mubr.msk.bf16.vlgmr.msra.gmra.mrb[20].mxu0 %vm963_vm9, %v947_v22 }
0x17f3   :  { %v1001_v57 = vpop.f32.mrb[20].mxu0 }
0x17f4   :  { %v1002_v24 = vadd.f32 %v1320_v23, %v1001_v57  ;;  %v1439_v26 = vpop.f32.mrb[21].mxu0 }
0x17f5   :  { %v1004_v27 = vpop.f32.mrb[22].mxu0 }
0x17f6   :  { %v1009_v28 = vrot.slane %v1002_v24, 2  ;;  %v1440_v29 = vpop.f32.mrb[23].mxu0  ;;  %v1012_v31 = vrot.slane %v1002_v24, 4  ;;  %v1015_v33 = vrot.slane %v1002_v24, 6  ;;  %v1005_v34 = vadd.f32 %v1320_v23, %v1004_v27 }
0x17f8   :  { %v1011_v30 = vmax.f32 %v1002_v24, %v1009_v28  ;;  %v1020_v39 = vrot.slane %v1005_v34, 2  ;;  %v1023_v41 = vrot.slane %v1005_v34, 4  ;;  %v1026_v43 = vrot.slane %v1005_v34, 6 }
0x17fa   :  { %v1014_v32 = vmax.f32 %v1011_v30, %v1012_v31 }
0x17fc   :  { %v1017_v36 = vmax.f32 %v1014_v32, %v1015_v33 }
0x17fe   :  { %v1018_v38 = vmax.f32 %v1017_v36, %v1005_v34 }
0x1800   :  { %v1022_v40 = vmax.f32 %v1018_v38, %v1020_v39 }
0x1802   :  { %v1025_v42 = vmax.f32 %v1022_v40, %v1023_v41 }
0x1804   :  { %v1028_v44 = vmax.f32 %v1025_v42, %v1026_v43  ;;  %v1593_v42 = vmov 1  }
0x1806   :  { %v1029_v45 = vsub.f32 %v1002_v24, %v1028_v44  ;;  %v1033_v46 = vrot.slane %v1028_v44, 6  ;;  %v1038_v47 = vrot.slane %v1028_v44, 4  ;;  %v1043_v49 = vrot.slane %v1028_v44, 2 }
0x1807   :  { %v1048_v50 = vsub.f32 %v1005_v34, %v1028_v44 }
0x1808   :  { %v1030_v51 = vmul.f32 1.442695, %v1029_v45  ;;  %v1035_v52 = vsub.f32 %v1002_v24, %v1033_v46  ;;  %v1040_v53 = vsub.f32 %v1002_v24, %v1038_v47  ;;  %v1045_v54 = vsub.f32 %v1002_v24, %v1043_v49 }
0x1809   :  { %v1051_v55 = vsub.f32 %v1005_v34, %v1033_v46  ;;  %v1054_v56 = vsub.f32 %v1005_v34, %v1038_v47  ;;  %v1057_v58 = vsub.f32 %v1005_v34, %v1043_v49  ;;  %v1049_v63 = vmul.f32 1.442695, %v1048_v50 }
0x180a   :  { %v1036_v61 = vmul.f32 1.442695, %v1035_v52  ;;  %v1041_v0 = vmul.f32 1.442695, %v1040_v53  ;;  %v1046_v59 = vmul.f32 1.442695, %v1045_v54  ;;  %1531 = vpow2.f32 %v1030_v51 }
0x180b   :  { %v1052_v60 = vmul.f32 1.442695, %v1051_v55  ;;  %v1055_v3 = vmul.f32 1.442695, %v1054_v56  ;;  %v1058_v4 = vmul.f32 1.442695, %v1057_v58 }
0x180c   :  { %1533 = vpow2.f32 %v1036_v61 }
0x180d   :  { %1535 = vpow2.f32 %v1041_v0 }
0x180e   :  { %1537 = vpow2.f32 %v1046_v59 }
0x180f   :  { %1539 = vpow2.f32 %v1052_v60 }
0x1810   :  { %1541 = vpow2.f32 %v1049_v63 }
0x1811   :  { %1543 = vpow2.f32 %v1055_v3 }
0x1812   :  { %1545 = vpow2.f32 %v1058_v4 }
0x1814   :  { %v1532_v1 = vpop.eup %1531 }
0x1816   :  { %v1534_v6 = vpop.eup %1533 }
0x1817   :  { %v1536_v7 = vpop.eup %1535  ;;  %v1061_v8 = vrot.slane %v1534_v6, 2 }
0x1818   :  { %v1538_v9 = vpop.eup %1537  ;;  %v1065_v12 = vrot.slane %v1536_v7, 4 }
0x1819   :  { %v1063_v10 = vadd.f32 %v1532_v1, %v1061_v8  ;;  %v1069_v14 = vrot.slane %v1538_v9, 6  ;;  %v1540_v16 = vpop.eup %1539 }
0x181a   :  { %v1542_v17 = vpop.eup %1541  ;;  %v1074_v21 = vrot.slane %v1540_v16, 2 }
0x181b   :  { %v1067_v13 = vadd.f32 %v1065_v12, %v1063_v10  ;;  %v1544_v19 = vpop.eup %1543 }
0x181c   :  { %v1546_v22 = vpop.eup %1545  ;;  %v1078_v57 = vrot.slane %v1544_v19, 4 }
0x181d   :  { %v1071_v18 = vadd.f32 %v1069_v14, %v1067_v13  ;;  %v1082_v26 = vrot.slane %v1546_v22, 6 }
0x181f   :  { %v1072_v20 = vadd.f32 %v1542_v17, %v1071_v18 }
0x1821   :  { %v1076_v23 = vadd.f32 %v1074_v21, %v1072_v20 }
0x1823   :  { %v1080_v24 = vadd.f32 %v1078_v57, %v1076_v23 }
0x1825   :  { %v1084_v27 = vadd.f32 %v1082_v26, %v1080_v24 }
0x1827   :  { %1547 = vrcp.f32 %v1084_v27 }
0x1831   :  { %v1548_v28 = vpop.eup %1547 }
0x1832   :  { %v1097_v29 = vmul.f32 %v1548_v28, %v1542_v17  ;;  %v1086_v30 = vmul.f32 %v1548_v28, %v1532_v1  ;;  %v1088_v31 = vrot.slane %v1548_v28, 6  ;;  %v1091_v32 = vrot.slane %v1548_v28, 4 }
0x1833   :  { %v1094_v33 = vrot.slane %v1548_v28, 2 }
0x1834   :  { %1139 = vperm.xlu0 %1452, %v1097_v29   ;;  %1103 = vperm.xlu1 %1450, %v1086_v30   ;;  %v1090_v34 = vmul.f32 %v1534_v6, %v1088_v31  ;;  %v1093_v36 = vmul.f32 %v1536_v7, %v1091_v32  ;;  %v1098_v38 = vmul.f32 %v1540_v16, %v1088_v31 }
0x1835   :  { %v1096_v39 = vmul.f32 %v1538_v9, %v1094_v33  ;;  %v1100_v40 = vmul.f32 %v1546_v22, %v1094_v33  ;;  %v1099_v41 = vmul.f32 %v1544_v19, %v1091_v32 }
0x1838   :  { %1109 = vperm.xlu0 %1452, %v1090_v34   ;;  %1451 = vset.pattern.permute.xlu1 %v1593_v42 }
0x1839   :  { %1175 = vperm.xlu1 %1451, %v1086_v30  }
0x183c   :  { %1119 = vperm.xlu0 %1452, %v1093_v36  }
0x183d   :  { %1207 = vperm.xlu1 %1451, %v1097_v29  }
0x1840   :  { %1453 = vset.pattern.permute.xlu0 %v1593_v42 }
0x1841   :  { %1189 = vperm.xlu0 %1453, %v1093_v36   ;;  %1180 = vperm.xlu1 %1451, %v1090_v34  }
0x1845   :  { %1213 = vperm.xlu0 %1453, %v1098_v38   ;;  %1454 = vset.pattern.permute.xlu1 %v1590_v5 }
0x1846   :  { %1129 = vperm.xlu1 %1454, %v1096_v39  }
0x1849   :  { %1458 = vset.pattern.permute.xlu0 %v1590_v5 }
0x184a   :  { %1166 = vperm.xlu0 %1458, %v1100_v40   ;;  %1455 = vset.pattern.permute.xlu1 %v1593_v42 }
0x184b   :  { %1198 = vperm.xlu1 %1455, %v1096_v39  }
0x184e   :  { %1459 = vset.pattern.permute.xlu0 %v1593_v42 }
0x184f   :  { %1456 = vset.pattern.permute.xlu1 %v1590_v5 }
0x1850   :  { %1146 = vperm.xlu1 %1456, %v1098_v38  }
0x1854   :  { %1156 = vperm.xlu1 %1456, %v1099_v41  }
0x1858   :  { %1457 = vset.pattern.permute.xlu1 %v1593_v42 }
0x1859   :  { %1222 = vperm.xlu1 %1457, %v1099_v41  }
0x185d   :  { %1231 = vperm.xlu1 %1457, %v1100_v40  }
0x18b3   :  { %v1140_v43 = vpop.permute.xlu0 %1139  ;;  %v1104_v44 = vpop.permute.xlu1 %1103 }
0x18b4   :  { %v1106_v58 = vmul.f32 %v1104_v44, %v1794_v15  ;;  %v1142_v16 = vmul.f32 %v1140_v43, %v1858_v48 }
0x18b7   :  { %v1110_v46 = vpop.permute.xlu0 %1109 }
0x18b8   :  { %v1176_v45 = vpop.permute.xlu1 %1175  ;;  %v1112_v51 = vmul.f32 %v1110_v46, %v1810_v37 }
0x18b9   :  { %v1178_v4 = vmul.f32 %v1176_v45, %v1794_v15 }
0x18ba   :  { %v1114_v55 = vrot.slane %v1112_v51, 2 }
0x18bb   :  { %v1120_v49 = vpop.permute.xlu0 %1119 }
0x18bc   :  { %v1208_v47 = vpop.permute.xlu1 %1207  ;;  %v1122_v54 = vmul.f32 %v1120_v49, %v1826_v62  ;;  %v1116_v63 = vadd.f32 %v1114_v55, %v1106_v58 }
0x18bd   :  { %v1210_v23 = vmul.f32 %v1208_v47, %v1858_v48 }
0x18be   :  { %v1124_v61 = vrot.slane %v1122_v54, 4 }
0x18c0   :  { %v1181_v50 = vpop.permute.xlu1 %1180  ;;  %v1190_v52 = vpop.permute.xlu0 %1189  ;;  %v1126_v7 = vadd.f32 %v1124_v61, %v1116_v63 }
0x18c1   :  { %v1183_v5 = vmul.f32 %v1181_v50, %v1810_v37  ;;  %v1192_v1 = vmul.f32 %v1190_v52, %v1826_v62 }
0x18c3   :  { %v1185_v59 = vrot.slane %v1183_v5, 2  ;;  %v1194_v12 = vrot.slane %v1192_v1, 4 }
0x18c4   :  { %v1214_v60 = vpop.permute.xlu0 %1213 }
0x18c5   :  { %v1130_v53 = vpop.permute.xlu1 %1129  ;;  %v1187_v8 = vadd.f32 %v1185_v59, %v1178_v4  ;;  %v1216_v57 = vmul.f32 %v1214_v60, %v1874_v11 }
0x18c6   :  { %v1132_v56 = vmul.f32 %v1130_v53, %v1842_v25 }
0x18c7   :  { %v1196_v18 = vadd.f32 %v1194_v12, %v1187_v8  ;;  %v1218_v31 = vrot.slane %v1216_v57, 2 }
0x18c8   :  { %v1134_v3 = vrot.slane %v1132_v56, 6 }
0x18c9   :  { %v1167_v13 = vpop.permute.xlu0 %1166 }
0x18ca   :  { %v1199_v0 = vpop.permute.xlu1 %1198  ;;  %v1136_v9 = vadd.f32 %v1134_v3, %v1126_v7  ;;  %v1169_v15 = vmul.f32 %v1167_v13, %v1911_v2 }
0x18cb   :  { %v1201_v6 = vmul.f32 %v1199_v0, %v1842_v25 }
0x18cc   :  { %v1143_v20 = vadd.f32 %v1142_v16, %v1136_v9  ;;  %v1171_v24 = vrot.slane %v1169_v15, 6 }
0x18cd   :  { %v1203_v14 = vrot.slane %v1201_v6, 6 }
0x18cf   :  { %v1147_v37 = vpop.permute.xlu1 %1146  ;;  %v1205_v25 = vadd.f32 %v1203_v14, %v1196_v18 }
0x18d0   :  { %v1149_v10 = vmul.f32 %v1147_v37, %v1874_v11 }
0x18d1   :  { %v1211_v28 = vadd.f32 %v1210_v23, %v1205_v25 }
0x18d2   :  { %v1151_v17 = vrot.slane %v1149_v10, 2 }
0x18d3   :  { %v1157_v19 = vpop.permute.xlu1 %1156  ;;  %v1220_v34 = vadd.f32 %v1218_v31, %v1211_v28 }
0x18d4   :  { %v1159_v62 = vmul.f32 %v1157_v19, %v1886_v35  ;;  %v1153_v21 = vadd.f32 %v1151_v17, %v1143_v20 }
0x18d6   :  { %v1161_v22 = vrot.slane %v1159_v62, 4 }
0x18d8   :  { %v1163_v26 = vadd.f32 %v1161_v22, %v1153_v21  ;;  %v1223_v27 = vpop.permute.xlu1 %1222 }
0x18d9   :  { %v1225_v29 = vmul.f32 %v1223_v27, %v1886_v35 }
0x18da   :  { %v1173_v30 = vadd.f32 %v1171_v24, %v1163_v26 }
0x18db   :  { %v1227_v32 = vrot.slane %v1225_v29, 4 }
0x18dc   :  { %1240 = vrot.lane.b32.xlu1 %v1173_v30, %s1592_s4  ;;  %v1232_v33 = vpop.permute.xlu1 %1231 }
0x18dd   :  { %v1234_v36 = vmul.f32 %v1232_v33, %v1911_v2  ;;  %v1229_v38 = vadd.f32 %v1227_v32, %v1220_v34 }
0x18df   :  { %v1236_v39 = vrot.slane %v1234_v36, 6 }
0x18e1   :  { %v1238_v48 = vadd.f32 %v1236_v39, %v1229_v38 }
0x18e3   :  { %1244 = vrot.lane.b32.xlu0 %v1238_v48, %s1594_s6 }
0x194e   :  { %v1241_v11 = vpop.permute.xlu1 %1240 }
0x1955   :  { %v1245_v40 = vpop.permute.xlu0 %1244 }
0x1956   :  { %v1247_v35 = vsel %vm191_vm8, %v1241_v11, %v1245_v40 }
0x1957   :  { %1249 = vst.msk [vmem:[#allocation4] sm:$0x3] %vm1248_vm10, %v1247_v35 }
0x1958   :  { %1572 = shalt.err (!%p1569_p9)
}
0x1959   :  { %s1573_s3 = scalar_lea.hbm %s1974_s9, 32 }
0x195a   :  { %p1574_p10 = scmp.ne.s32.totalorder %s1974_s9, %s1573_s3  ;;  %p1577_p11 = scmp.lt.u32.totalorder %s1573_s3, %s1974_s9 }
0x195c   :  { %p1579_p12 = pnand %p1577_p11, %p1574_p10 }
0x195e   :  { %1582 = shalt.err (!%p1579_p12)
}
0x195f   :  { %1259 = dma.vmem_to_hbm [thread:$0]  %s1257_s8, 32, %s1974_s9, [#allocation5]  }
0x1960   :  { %1585 = dma.done.wait [#allocation5], 32  }
0x1961   :  { %1586 = vsyncadd [#allocation5], 4294967264 }
0x1962   :  { %1263 = vsyncpa [#allocation5], 1 }

</bundles_post_ra>
